<compile_context>
chip_gen: v7x
topology: tpu7x:2x2x1
jax: 0.10.0
libtpu: 0.0.40
codegen_flags: <defaults>
</compile_context>

<pallas_src>
import numpy as np
import jax
import jax.numpy as jnp
from jax.experimental import pallas as pl
from jax.experimental.pallas import tpu as pltpu

# ---------------- small demo configuration ----------------
B = 2         # batch
F_IN = 4      # feature_channel
C_OUT = 3     # output_channel
MODES = 4     # modes1
WIDTH = 16    # width
L = 16        # spatial length
PAD = 2       # self.padding
LP = L + 2 * PAD                        # FFT length after F.pad
LP_PAD = ((LP + 7) // 8) * 8            # sublane-aligned slab length per batch element
OUT_LANES = 128                         # lane-dense output width (crop to C_OUT in wrapper)

# The irfft-as-matmul construction is only valid while the Nyquist bin is
# never one of the kept modes.
assert MODES <= LP // 2, "MODES must be <= LP // 2 (Nyquist bin untouched)"
assert LP_PAD % 8 == 0 and LP_PAD >= LP


def _gelu(x):
    # TODO(synk): torch F.gelu defaults to the exact erf form; tanh approximation
    # used here (and in the reference) because erf has no verified Mosaic lowering.
    c = float(np.sqrt(2.0 / np.pi))
    return 0.5 * x * (1.0 + jnp.tanh(c * (x + 0.044715 * x * x * x)))


# ---------------- the Pallas kernel (one batch slab per grid step) ----------------
def fno1d_kernel(x_ref, rowmask_ref, cmat_ref, idft_ref, sel_ref,
                 fc0_w_ref, fc0_b_ref,
                 wblk_ref, wc_ref, bc_ref,
                 fc1_w_ref, fc1_b_ref, fc2_w_ref, fc2_b_ref,
                 out_ref):
    f32 = jnp.float32
    x = x_ref[...]                                                      # (R, F_IN), R = bb*LP_PAD

    # fc0 (nn.Linear), then zero the rows corresponding to the F.pad zeros and
    # the sublane-alignment rows (the bias must not leak into the padded rows).
    v = jnp.dot(x, fc0_w_ref[...], preferred_element_type=f32) + fc0_b_ref[...]
    v = v * rowmask_ref[...]                                            # (R, WIDTH)

    cmat = cmat_ref[...]                                                # (2*bb*M, R)
    idft = idft_ref[...]                                                # (R, 2*bb*M)
    sel_full = sel_ref[...]                                             # (2*bb*M, 2*M*WIDTH)
    half = cmat.shape[0] // 2                                           # = bb*MODES

    for layer in range(4):
        # --- truncated rfft of every fused batch element in ONE matmul ---
        # f_a = [fr ; fi] (per batch block).  The swapped ordering [fi ; fr] is a
        # sublane rotate by half the rows (+half and -half are the same rotation).
        f_a = jnp.dot(cmat, v, preferred_element_type=f32)              # (2*bb*M, WIDTH)
        f_b = pltpu.roll(f_a, shift=half, axis=0)                       # [fi ; fr]

        # --- per-mode complex channel mix as ONE 128-wide-contraction matmul ---
        # lane block k holds f_a (multiplies wr[k]); lane block MODES+k holds f_b
        # (multiplies wi[k]); sel_full carries per-(row, lane) signs so that
        #   row k        -> out_r[k] = fr[k]@wr[k] - fi[k]@wi[k]
        #   row bb*M + k -> out_i[k] = fi[k]@wr[k] + fr[k]@wi[k]
        xblk = jnp.concatenate([f_a] * MODES + [f_b] * MODES, axis=1) * sel_full
        out_ri = jnp.dot(xblk, wblk_ref[layer],
                         preferred_element_type=f32)                    # (2*bb*M, WIDTH)

        # --- fused truncated irfft + pointwise 1x1 Conv1d: one K = 2bbM+W matmul ---
        lhs = jnp.concatenate([idft, v], axis=1)                        # (R, 2*bb*M + WIDTH)
        rhs = jnp.concatenate([out_ri, wc_ref[layer]], axis=0)          # (2*bb*M + WIDTH, WIDTH)
        v = jnp.dot(lhs, rhs, preferred_element_type=f32) + bc_ref[layer]
        if layer < 3:                                                   # no gelu after the 4th block
            v = _gelu(v)

    # fc1 / fc2 are per-position; fc2 is padded to 128 output lanes so the final
    # store is an unmasked lane-dense vst; the wrapper crops rows and channels.
    h1 = _gelu(jnp.dot(v, fc1_w_ref[...], preferred_element_type=f32) + fc1_b_ref[...])
    h2 = jnp.dot(h1, fc2_w_ref[...], preferred_element_type=f32) + fc2_b_ref[...]
    out_ref[...] = h2.astype(out_ref.dtype)


# ---------------- host-side constants ----------------
def _dft_matrices():
    n = np.arange(LP)[None, :]
    k = np.arange(MODES)[:, None]
    ang = 2.0 * np.pi * k * n / LP
    cos_m = np.cos(ang).astype(np.float32)                              # (MODES, LP)
    sin_m = np.sin(ang).astype(np.float32)
    coef = np.full((MODES, 1), 2.0, np.float32)
    coef[0, 0] = 1.0                                                    # DC is not doubled
    icos_t = (coef * cos_m / LP).T.astype(np.float32)                   # (LP, MODES)
    isin_t = (-coef * sin_m / LP).T.astype(np.float32)                  # (LP, MODES)
    return cos_m, sin_m, icos_t, isin_t


def make_constants(bb):
    """DFT / iDFT / selection / row-mask constants for a batch block of size bb."""
    cos_m, sin_m, icos_t, isin_t = _dft_matrices()
    m = bb * MODES                                                      # Re (and Im) row count

    cmat = np.zeros((2 * m, bb * LP_PAD), np.float32)                   # block-diagonal fwd DFT
    idft = np.zeros((bb * LP_PAD, 2 * m), np.float32)                   # block-diagonal inv DFT
    for b in range(bb):
        r0, c0 = b * MODES, b * LP_PAD
        cmat[r0:r0 + MODES, c0:c0 + LP] = cos_m
        cmat[m + r0:m + r0 + MODES, c0:c0 + LP] = -sin_m
        idft[c0:c0 + LP, r0:r0 + MODES] = icos_t
        idft[c0:c0 + LP, m + r0:m + r0 + MODES] = isin_t

    # per-(row, lane-block) selection + sign for the fused complex mix, expanded
    # to WIDTH lanes per block so the kernel does a single full-width multiply.
    sel = np.zeros((2 * m, 2 * MODES), np.float32)
    for r in range(2 * m):
        k0 = r % MODES
        sel[r, k0] = 1.0
        sel[r, MODES + k0] = -1.0 if r < m else 1.0
    sel_full = np.repeat(sel, WIDTH, axis=1)                            # (2*m, 2*MODES*WIDTH)

    # 1 on real data rows, 0 on F.pad rows and sublane-alignment rows
    rowmask = np.zeros((bb * LP_PAD, 1), np.float32)
    for b in range(bb):
        rowmask[b * LP_PAD + PAD:b * LP_PAD + PAD + L, 0] = 1.0

    return (jnp.asarray(cmat), jnp.asarray(idft),
            jnp.asarray(sel_full), jnp.asarray(rowmask))


def pack_spectral_weights(wr, wi):
    """(4, MODES, W, W) real/imag -> (4, 2*MODES*W, W) block weight (rows k*W:(k+1)*W = wr[k],
    rows (MODES+k)*W:... = wi[k])."""
    blk = jnp.concatenate([wr, wi], axis=1)                             # (4, 2*M, W, W)
    return blk.reshape(4, 2 * MODES * WIDTH, WIDTH)


def _pick_batch_block(batch):
    """Cap the per-grid-step batch block.

    The block-diagonal cmat/idft constants grow O(bb^2) in bytes and MXU MACs,
    so a modest bb with grid = batch/bb beats fusing everything into one slab
    (per-grid-step overhead is only ~0.35us and the constant blocks are not
    re-fetched).  v7x: half the VMEM (64 MiB) with constants duplicated on both
    TensorCores -> smaller cap; tiny batches are NOT split across its 2 cores
    (overhead-dominated slabs don't benefit)."""
    try:
        kind = jax.devices()[0].device_kind.lower()
    except Exception:
        kind = ""
    cap = 4 if ("v7" in kind or "7x" in kind) else 8
    divisors = [d for d in range(1, min(batch, cap) + 1) if batch % d == 0]
    # prefer bb*MODES % 8 == 0 so the in-kernel Re/Im sublane roll is tile-aligned
    aligned = [d for d in divisors if (d * MODES) % 8 == 0]
    return max(aligned) if aligned else max(divisors)


# ---------------- deterministic parameter init ----------------
def make_params(key):
    ks = jax.random.split(key, 10)

    def init(k, shape, scale):
        return (scale * jax.random.normal(k, shape, jnp.float32)).astype(jnp.float32)

    return dict(
        fc0_w=init(ks[0], (F_IN, WIDTH), 1.0 / np.sqrt(F_IN)),
        fc0_b=init(ks[1], (1, WIDTH), 0.1),
        # spectral weights, (layer, mode, in, out); real & imag parts
        wr=init(ks[2], (4, MODES, WIDTH, WIDTH), 1.0 / (WIDTH * WIDTH)),
        wi=init(ks[3], (4, MODES, WIDTH, WIDTH), 1.0 / (WIDTH * WIDTH)),
        # 1x1 conv weights (layer, in, out) + bias
        wc=init(ks[4], (4, WIDTH, WIDTH), 1.0 / np.sqrt(WIDTH)),
        bc=init(ks[5], (4, 1, WIDTH), 0.1),
        fc1_w=init(ks[6], (WIDTH, WIDTH), 1.0 / np.sqrt(WIDTH)),
        fc1_b=init(ks[7], (1, WIDTH), 0.1),
        fc2_w=init(ks[8], (WIDTH, C_OUT), 1.0 / np.sqrt(WIDTH)),
        fc2_b=init(ks[9], (1, C_OUT), 0.1),
    )


# ---------------- wrapper: pallas_call ----------------
def fno1d_forward(x_ncl, params, batch_block=None):
    # x_ncl: (B, F_IN, L), same layout as the torch module input
    b_total = x_ncl.shape[0]
    bb = batch_block if batch_block is not None else _pick_batch_block(b_total)
    assert b_total % bb == 0
    grid = (b_total // bb,)
    rows = bb * LP_PAD

    # channel-last, zero-padded to LP (F.pad) and to LP_PAD (sublane alignment),
    # then batch-stacked along rows so one grid step works on a (rows, .) slab.
    x = jnp.transpose(x_ncl, (0, 2, 1)).astype(jnp.float32)             # (B, L, F_IN)
    x = jnp.pad(x, ((0, 0), (PAD, LP_PAD - L - PAD), (0, 0)))           # (B, LP_PAD, F_IN)
    x = x.reshape(b_total * LP_PAD, F_IN)

    cmat, idft, sel_full, rowmask = make_constants(bb)
    wblk = pack_spectral_weights(params["wr"], params["wi"])

    # lane-dense output: pad fc2 to 128 output columns, crop C_OUT in the wrapper.
    fc2_w_pad = jnp.zeros((WIDTH, OUT_LANES), jnp.float32).at[:, :C_OUT].set(params["fc2_w"])
    fc2_b_pad = jnp.zeros((1, OUT_LANES), jnp.float32).at[:, :C_OUT].set(params["fc2_b"])

    inputs = (x, rowmask, cmat, idft, sel_full,
              params["fc0_w"], params["fc0_b"],
              wblk, params["wc"], params["bc"],
              params["fc1_w"], params["fc1_b"], fc2_w_pad, fc2_b_pad)

    def full_spec(a):
        nd = a.ndim
        return pl.BlockSpec(a.shape, lambda i, _nd=nd: (0,) * _nd)

    in_specs = [pl.BlockSpec((rows, F_IN), lambda i: (i, 0))]
    in_specs += [full_spec(a) for a in inputs[1:]]

    out = pl.pallas_call(
        fno1d_kernel,
        out_shape=jax.ShapeDtypeStruct((b_total * LP_PAD, OUT_LANES), jnp.float32),
        grid_spec=pltpu.PrefetchScalarGridSpec(
            num_scalar_prefetch=0,
            grid=grid,
            in_specs=in_specs,
            out_specs=pl.BlockSpec((rows, OUT_LANES), lambda i: (i, 0)),
        ),
        compiler_params=pltpu.CompilerParams(
            dimension_semantics=("parallel",),
            # explicit scoped-VMEM budget (bb is capped so constants stay tiny;
            # leaves headroom for the double-buffered x / out slabs at larger B)
            vmem_limit_bytes=32 * 1024 * 1024,
        ),
    )(*inputs)

    out = out.reshape(b_total, LP_PAD, OUT_LANES)[:, PAD:PAD + L, :C_OUT]  # crop rows + channels
    return jnp.transpose(out, (0, 2, 1))                                # (B, C_OUT, L)


# ---------------- pure-JAX reference (uses real FFTs) for a sanity check ----------------
def fno1d_reference(x_ncl, params):
    b = x_ncl.shape[0]
    x = jnp.transpose(x_ncl, (0, 2, 1)).astype(jnp.float32)             # (B, L, F_IN)
    h = x @ params["fc0_w"] + params["fc0_b"]                           # (B, L, W)
    v = jnp.transpose(h, (0, 2, 1))                                     # (B, W, L)
    v = jnp.pad(v, ((0, 0), (0, 0), (PAD, PAD)))                        # (B, W, LP)
    for layer in range(4):
        w_c = params["wr"][layer] + 1j * params["wi"][layer]            # (MODES, W_in, W_out)
        vft = jnp.fft.rfft(v, axis=-1)[..., :MODES]                     # (B, W_in, MODES)
        oft = jnp.einsum("bik,kio->bok", vft, w_c)
        full = jnp.zeros((b, WIDTH, LP // 2 + 1), jnp.complex64).at[..., :MODES].set(oft)
        spec = jnp.fft.irfft(full, n=LP, axis=-1)
        pw = jnp.einsum("bin,io->bon", v, params["wc"][layer]) + params["bc"][layer].reshape(1, WIDTH, 1)
        v = spec + pw
        if layer < 3:
            v = _gelu(v)
    v = jnp.transpose(v, (0, 2, 1))                                     # (B, LP, W)
    h1 = _gelu(v @ params["fc1_w"] + params["fc1_b"])
    h2 = h1 @ params["fc2_w"] + params["fc2_b"]                         # (B, LP, C_OUT)
    return jnp.transpose(h2, (0, 2, 1))[:, :, PAD:-PAD]                 # (B, C_OUT, L)


if __name__ == "__main__":
    key = jax.random.PRNGKey(0)
    kx, kp = jax.random.split(key)
    x = jax.random.normal(kx, (B, F_IN, L), jnp.float32)
    params = make_params(kp)

    y = jax.block_until_ready(fno1d_forward(x, params))
    assert y.shape == (B, C_OUT, L), y.shape

    y_ref = jax.block_until_ready(fno1d_reference(x, params))
    np.testing.assert_allclose(np.asarray(y), np.asarray(y_ref), rtol=2e-4, atol=2e-4)

    print("KERNEL_OK")
</pallas_src>

<mosaic_0001>
module attributes {stable_mosaic.version = 11 : i64} {
  func.func @fno1d_kernel(%arg0: i32, %arg1: memref<48x4xf32, #tpu.memory_space<vmem>>, %arg2: memref<48x1xf32, #tpu.memory_space<vmem>>, %arg3: memref<16x48xf32, #tpu.memory_space<vmem>>, %arg4: memref<48x16xf32, #tpu.memory_space<vmem>>, %arg5: memref<16x128xf32, #tpu.memory_space<vmem>>, %arg6: memref<4x16xf32, #tpu.memory_space<vmem>>, %arg7: memref<1x16xf32, #tpu.memory_space<vmem>>, %arg8: memref<4x128x16xf32, #tpu.memory_space<vmem>>, %arg9: memref<4x16x16xf32, #tpu.memory_space<vmem>>, %arg10: memref<4x1x16xf32, #tpu.memory_space<vmem>>, %arg11: memref<16x16xf32, #tpu.memory_space<vmem>>, %arg12: memref<1x16xf32, #tpu.memory_space<vmem>>, %arg13: memref<16x128xf32, #tpu.memory_space<vmem>>, %arg14: memref<1x128xf32, #tpu.memory_space<vmem>>, %arg15: memref<48x128xf32, #tpu.memory_space<vmem>>) attributes {dimension_semantics = [#tpu.dimension_semantics<parallel>], iteration_bounds = array<i64: 1>, scalar_prefetch = 0 : i64, scratch_operands = 0 : i64, tpu.core_type = #tpu.core_type<tc>, window_params = [{transform_indices = @transform_0, window_bounds = array<i64: 48, 4>}, {pipeline_mode = #tpu.pipeline_mode<synchronous>, transform_indices = @transform_1, window_bounds = array<i64: 48, 1>}, {pipeline_mode = #tpu.pipeline_mode<synchronous>, transform_indices = @transform_2, window_bounds = array<i64: 16, 48>}, {pipeline_mode = #tpu.pipeline_mode<synchronous>, transform_indices = @transform_3, window_bounds = array<i64: 48, 16>}, {pipeline_mode = #tpu.pipeline_mode<synchronous>, transform_indices = @transform_4, window_bounds = array<i64: 16, 128>}, {pipeline_mode = #tpu.pipeline_mode<synchronous>, transform_indices = @transform_5, window_bounds = array<i64: 4, 16>}, {pipeline_mode = #tpu.pipeline_mode<synchronous>, transform_indices = @transform_6, window_bounds = array<i64: 1, 16>}, {pipeline_mode = #tpu.pipeline_mode<synchronous>, transform_indices = @transform_7, window_bounds = array<i64: 4, 128, 16>}, {pipeline_mode = #tpu.pipeline_mode<synchronous>, transform_indices = @transform_8, window_bounds = array<i64: 4, 16, 16>}, {pipeline_mode = #tpu.pipeline_mode<synchronous>, transform_indices = @transform_9, window_bounds = array<i64: 4, 1, 16>}, {pipeline_mode = #tpu.pipeline_mode<synchronous>, transform_indices = @transform_10, window_bounds = array<i64: 16, 16>}, {pipeline_mode = #tpu.pipeline_mode<synchronous>, transform_indices = @transform_11, window_bounds = array<i64: 1, 16>}, {pipeline_mode = #tpu.pipeline_mode<synchronous>, transform_indices = @transform_12, window_bounds = array<i64: 16, 128>}, {pipeline_mode = #tpu.pipeline_mode<synchronous>, transform_indices = @transform_13, window_bounds = array<i64: 1, 128>}, {transform_indices = @transform_14, window_bounds = array<i64: 48, 128>}]} {
    %c0 = arith.constant 0 : index
    %c0_0 = arith.constant 0 : index
    %0 = vector.load %arg1[%c0, %c0_0] : memref<48x4xf32, #tpu.memory_space<vmem>>, vector<48x4xf32>
    %c0_1 = arith.constant 0 : index
    %c0_2 = arith.constant 0 : index
    %1 = vector.load %arg6[%c0_1, %c0_2] : memref<4x16xf32, #tpu.memory_space<vmem>>, vector<4x16xf32>
    %cst = arith.constant dense<0.000000e+00> : vector<48x16xf32>
    %2 = tpu.matmul %0, %1, %cst {dimension_numbers = #tpu.dot_dimension_numbers<[1], [0], [0], [1], [0, 0, 1, 1], [], []>} : vector<48x4xf32>, vector<4x16xf32>, vector<48x16xf32> -> vector<48x16xf32>
    %c0_3 = arith.constant 0 : index
    %c0_4 = arith.constant 0 : index
    %3 = vector.load %arg7[%c0_3, %c0_4] : memref<1x16xf32, #tpu.memory_space<vmem>>, vector<1x16xf32>
    %4 = vector.broadcast %3 : vector<1x16xf32> to vector<48x16xf32>
    %5 = arith.addf %2, %4 : vector<48x16xf32>
    %c0_5 = arith.constant 0 : index
    %c0_6 = arith.constant 0 : index
    %6 = vector.load %arg2[%c0_5, %c0_6] : memref<48x1xf32, #tpu.memory_space<vmem>>, vector<48x1xf32>
    %7 = vector.broadcast %6 : vector<48x1xf32> to vector<48x16xf32>
    %8 = arith.mulf %5, %7 : vector<48x16xf32>
    %c0_7 = arith.constant 0 : index
    %c0_8 = arith.constant 0 : index
    %9 = vector.load %arg3[%c0_7, %c0_8] : memref<16x48xf32, #tpu.memory_space<vmem>>, vector<16x48xf32>
    %c0_9 = arith.constant 0 : index
    %c0_10 = arith.constant 0 : index
    %10 = vector.load %arg4[%c0_9, %c0_10] : memref<48x16xf32, #tpu.memory_space<vmem>>, vector<48x16xf32>
    %c0_11 = arith.constant 0 : index
    %c0_12 = arith.constant 0 : index
    %11 = vector.load %arg5[%c0_11, %c0_12] : memref<16x128xf32, #tpu.memory_space<vmem>>, vector<16x128xf32>
    %cst_13 = arith.constant dense<0.000000e+00> : vector<16x16xf32>
    %12 = tpu.matmul %9, %8, %cst_13 {dimension_numbers = #tpu.dot_dimension_numbers<[1], [0], [0], [1], [0, 0, 1, 1], [], []>} : vector<16x48xf32>, vector<48x16xf32>, vector<16x16xf32> -> vector<16x16xf32>
    %c8_i32 = arith.constant 8 : i32
    %13 = tpu.dynamic_rotate %12 by %c8_i32 dim 0 : vector<16x16xf32>, i32 -> vector<16x16xf32>
    %14 = tpu.concatenate %12, %12, %12, %12, %13, %13, %13, %13 in 1 : vector<16x16xf32>, vector<16x16xf32>, vector<16x16xf32>, vector<16x16xf32>, vector<16x16xf32>, vector<16x16xf32>, vector<16x16xf32>, vector<16x16xf32> -> vector<16x128xf32>
    %15 = arith.mulf %14, %11 : vector<16x128xf32>
    %c0_14 = arith.constant 0 : index
    %c0_15 = arith.constant 0 : index
    %c0_16 = arith.constant 0 : index
    %16 = vector.load %arg8[%c0_14, %c0_15, %c0_16] : memref<4x128x16xf32, #tpu.memory_space<vmem>>, vector<1x128x16xf32>
    %17 = vector.shape_cast %16 : vector<1x128x16xf32> to vector<128x16xf32>
    %cst_17 = arith.constant dense<0.000000e+00> : vector<16x16xf32>
    %18 = tpu.matmul %15, %17, %cst_17 {dimension_numbers = #tpu.dot_dimension_numbers<[1], [0], [0], [1], [0, 0, 1, 1], [], []>} : vector<16x128xf32>, vector<128x16xf32>, vector<16x16xf32> -> vector<16x16xf32>
    %19 = tpu.concatenate %10, %8 in 1 : vector<48x16xf32>, vector<48x16xf32> -> vector<48x32xf32>
    %c0_18 = arith.constant 0 : index
    %c0_19 = arith.constant 0 : index
    %c0_20 = arith.constant 0 : index
    %20 = vector.load %arg9[%c0_18, %c0_19, %c0_20] : memref<4x16x16xf32, #tpu.memory_space<vmem>>, vector<1x16x16xf32>
    %21 = vector.shape_cast %20 : vector<1x16x16xf32> to vector<16x16xf32>
    %22 = tpu.concatenate %18, %21 in 0 : vector<16x16xf32>, vector<16x16xf32> -> vector<32x16xf32>
    %cst_21 = arith.constant dense<0.000000e+00> : vector<48x16xf32>
    %23 = tpu.matmul %19, %22, %cst_21 {dimension_numbers = #tpu.dot_dimension_numbers<[1], [0], [0], [1], [0, 0, 1, 1], [], []>} : vector<48x32xf32>, vector<32x16xf32>, vector<48x16xf32> -> vector<48x16xf32>
    %c0_22 = arith.constant 0 : index
    %c0_23 = arith.constant 0 : index
    %c0_24 = arith.constant 0 : index
    %24 = vector.load %arg10[%c0_22, %c0_23, %c0_24] : memref<4x1x16xf32, #tpu.memory_space<vmem>>, vector<1x1x16xf32>
    %25 = vector.shape_cast %24 : vector<1x1x16xf32> to vector<1x16xf32>
    %26 = vector.broadcast %25 : vector<1x16xf32> to vector<48x16xf32>
    %27 = arith.addf %23, %26 : vector<48x16xf32>
    %cst_25 = arith.constant 5.000000e-01 : f32
    %28 = vector.broadcast %cst_25 : f32 to vector<48x16xf32>
    %29 = arith.mulf %28, %27 : vector<48x16xf32>
    %cst_26 = arith.constant 4.471500e-02 : f32
    %30 = vector.broadcast %cst_26 : f32 to vector<48x16xf32>
    %31 = arith.mulf %30, %27 : vector<48x16xf32>
    %32 = arith.mulf %31, %27 : vector<48x16xf32>
    %33 = arith.mulf %32, %27 : vector<48x16xf32>
    %34 = arith.addf %27, %33 : vector<48x16xf32>
    %cst_27 = arith.constant 0.797884583 : f32
    %35 = vector.broadcast %cst_27 : f32 to vector<48x16xf32>
    %36 = arith.mulf %35, %34 : vector<48x16xf32>
    %37 = math.tanh %36 : vector<48x16xf32>
    %cst_28 = arith.constant 1.000000e+00 : f32
    %38 = vector.broadcast %cst_28 : f32 to vector<48x16xf32>
    %39 = arith.addf %38, %37 : vector<48x16xf32>
    %40 = arith.mulf %29, %39 : vector<48x16xf32>
    %cst_29 = arith.constant dense<0.000000e+00> : vector<16x16xf32>
    %41 = tpu.matmul %9, %40, %cst_29 {dimension_numbers = #tpu.dot_dimension_numbers<[1], [0], [0], [1], [0, 0, 1, 1], [], []>} : vector<16x48xf32>, vector<48x16xf32>, vector<16x16xf32> -> vector<16x16xf32>
    %c8_i32_30 = arith.constant 8 : i32
    %42 = tpu.dynamic_rotate %41 by %c8_i32_30 dim 0 : vector<16x16xf32>, i32 -> vector<16x16xf32>
    %43 = tpu.concatenate %41, %41, %41, %41, %42, %42, %42, %42 in 1 : vector<16x16xf32>, vector<16x16xf32>, vector<16x16xf32>, vector<16x16xf32>, vector<16x16xf32>, vector<16x16xf32>, vector<16x16xf32>, vector<16x16xf32> -> vector<16x128xf32>
    %44 = arith.mulf %43, %11 : vector<16x128xf32>
    %c1 = arith.constant 1 : index
    %c0_31 = arith.constant 0 : index
    %c0_32 = arith.constant 0 : index
    %45 = vector.load %arg8[%c1, %c0_31, %c0_32] : memref<4x128x16xf32, #tpu.memory_space<vmem>>, vector<1x128x16xf32>
    %46 = vector.shape_cast %45 : vector<1x128x16xf32> to vector<128x16xf32>
    %cst_33 = arith.constant dense<0.000000e+00> : vector<16x16xf32>
    %47 = tpu.matmul %44, %46, %cst_33 {dimension_numbers = #tpu.dot_dimension_numbers<[1], [0], [0], [1], [0, 0, 1, 1], [], []>} : vector<16x128xf32>, vector<128x16xf32>, vector<16x16xf32> -> vector<16x16xf32>
    %48 = tpu.concatenate %10, %40 in 1 : vector<48x16xf32>, vector<48x16xf32> -> vector<48x32xf32>
    %c1_34 = arith.constant 1 : index
    %c0_35 = arith.constant 0 : index
    %c0_36 = arith.constant 0 : index
    %49 = vector.load %arg9[%c1_34, %c0_35, %c0_36] : memref<4x16x16xf32, #tpu.memory_space<vmem>>, vector<1x16x16xf32>
    %50 = vector.shape_cast %49 : vector<1x16x16xf32> to vector<16x16xf32>
    %51 = tpu.concatenate %47, %50 in 0 : vector<16x16xf32>, vector<16x16xf32> -> vector<32x16xf32>
    %cst_37 = arith.constant dense<0.000000e+00> : vector<48x16xf32>
    %52 = tpu.matmul %48, %51, %cst_37 {dimension_numbers = #tpu.dot_dimension_numbers<[1], [0], [0], [1], [0, 0, 1, 1], [], []>} : vector<48x32xf32>, vector<32x16xf32>, vector<48x16xf32> -> vector<48x16xf32>
    %c1_38 = arith.constant 1 : index
    %c0_39 = arith.constant 0 : index
    %c0_40 = arith.constant 0 : index
    %53 = vector.load %arg10[%c1_38, %c0_39, %c0_40] : memref<4x1x16xf32, #tpu.memory_space<vmem>>, vector<1x1x16xf32>
    %54 = vector.shape_cast %53 : vector<1x1x16xf32> to vector<1x16xf32>
    %55 = vector.broadcast %54 : vector<1x16xf32> to vector<48x16xf32>
    %56 = arith.addf %52, %55 : vector<48x16xf32>
    %cst_41 = arith.constant 5.000000e-01 : f32
    %57 = vector.broadcast %cst_41 : f32 to vector<48x16xf32>
    %58 = arith.mulf %57, %56 : vector<48x16xf32>
    %cst_42 = arith.constant 4.471500e-02 : f32
    %59 = vector.broadcast %cst_42 : f32 to vector<48x16xf32>
    %60 = arith.mulf %59, %56 : vector<48x16xf32>
    %61 = arith.mulf %60, %56 : vector<48x16xf32>
    %62 = arith.mulf %61, %56 : vector<48x16xf32>
    %63 = arith.addf %56, %62 : vector<48x16xf32>
    %cst_43 = arith.constant 0.797884583 : f32
    %64 = vector.broadcast %cst_43 : f32 to vector<48x16xf32>
    %65 = arith.mulf %64, %63 : vector<48x16xf32>
    %66 = math.tanh %65 : vector<48x16xf32>
    %cst_44 = arith.constant 1.000000e+00 : f32
    %67 = vector.broadcast %cst_44 : f32 to vector<48x16xf32>
    %68 = arith.addf %67, %66 : vector<48x16xf32>
    %69 = arith.mulf %58, %68 : vector<48x16xf32>
    %cst_45 = arith.constant dense<0.000000e+00> : vector<16x16xf32>
    %70 = tpu.matmul %9, %69, %cst_45 {dimension_numbers = #tpu.dot_dimension_numbers<[1], [0], [0], [1], [0, 0, 1, 1], [], []>} : vector<16x48xf32>, vector<48x16xf32>, vector<16x16xf32> -> vector<16x16xf32>
    %c8_i32_46 = arith.constant 8 : i32
    %71 = tpu.dynamic_rotate %70 by %c8_i32_46 dim 0 : vector<16x16xf32>, i32 -> vector<16x16xf32>
    %72 = tpu.concatenate %70, %70, %70, %70, %71, %71, %71, %71 in 1 : vector<16x16xf32>, vector<16x16xf32>, vector<16x16xf32>, vector<16x16xf32>, vector<16x16xf32>, vector<16x16xf32>, vector<16x16xf32>, vector<16x16xf32> -> vector<16x128xf32>
    %73 = arith.mulf %72, %11 : vector<16x128xf32>
    %c2 = arith.constant 2 : index
    %c0_47 = arith.constant 0 : index
    %c0_48 = arith.constant 0 : index
    %74 = vector.load %arg8[%c2, %c0_47, %c0_48] : memref<4x128x16xf32, #tpu.memory_space<vmem>>, vector<1x128x16xf32>
    %75 = vector.shape_cast %74 : vector<1x128x16xf32> to vector<128x16xf32>
    %cst_49 = arith.constant dense<0.000000e+00> : vector<16x16xf32>
    %76 = tpu.matmul %73, %75, %cst_49 {dimension_numbers = #tpu.dot_dimension_numbers<[1], [0], [0], [1], [0, 0, 1, 1], [], []>} : vector<16x128xf32>, vector<128x16xf32>, vector<16x16xf32> -> vector<16x16xf32>
    %77 = tpu.concatenate %10, %69 in 1 : vector<48x16xf32>, vector<48x16xf32> -> vector<48x32xf32>
    %c2_50 = arith.constant 2 : index
    %c0_51 = arith.constant 0 : index
    %c0_52 = arith.constant 0 : index
    %78 = vector.load %arg9[%c2_50, %c0_51, %c0_52] : memref<4x16x16xf32, #tpu.memory_space<vmem>>, vector<1x16x16xf32>
    %79 = vector.shape_cast %78 : vector<1x16x16xf32> to vector<16x16xf32>
    %80 = tpu.concatenate %76, %79 in 0 : vector<16x16xf32>, vector<16x16xf32> -> vector<32x16xf32>
    %cst_53 = arith.constant dense<0.000000e+00> : vector<48x16xf32>
    %81 = tpu.matmul %77, %80, %cst_53 {dimension_numbers = #tpu.dot_dimension_numbers<[1], [0], [0], [1], [0, 0, 1, 1], [], []>} : vector<48x32xf32>, vector<32x16xf32>, vector<48x16xf32> -> vector<48x16xf32>
    %c2_54 = arith.constant 2 : index
    %c0_55 = arith.constant 0 : index
    %c0_56 = arith.constant 0 : index
    %82 = vector.load %arg10[%c2_54, %c0_55, %c0_56] : memref<4x1x16xf32, #tpu.memory_space<vmem>>, vector<1x1x16xf32>
    %83 = vector.shape_cast %82 : vector<1x1x16xf32> to vector<1x16xf32>
    %84 = vector.broadcast %83 : vector<1x16xf32> to vector<48x16xf32>
    %85 = arith.addf %81, %84 : vector<48x16xf32>
    %cst_57 = arith.constant 5.000000e-01 : f32
    %86 = vector.broadcast %cst_57 : f32 to vector<48x16xf32>
    %87 = arith.mulf %86, %85 : vector<48x16xf32>
    %cst_58 = arith.constant 4.471500e-02 : f32
    %88 = vector.broadcast %cst_58 : f32 to vector<48x16xf32>
    %89 = arith.mulf %88, %85 : vector<48x16xf32>
    %90 = arith.mulf %89, %85 : vector<48x16xf32>
    %91 = arith.mulf %90, %85 : vector<48x16xf32>
    %92 = arith.addf %85, %91 : vector<48x16xf32>
    %cst_59 = arith.constant 0.797884583 : f32
    %93 = vector.broadcast %cst_59 : f32 to vector<48x16xf32>
    %94 = arith.mulf %93, %92 : vector<48x16xf32>
    %95 = math.tanh %94 : vector<48x16xf32>
    %cst_60 = arith.constant 1.000000e+00 : f32
    %96 = vector.broadcast %cst_60 : f32 to vector<48x16xf32>
    %97 = arith.addf %96, %95 : vector<48x16xf32>
    %98 = arith.mulf %87, %97 : vector<48x16xf32>
    %cst_61 = arith.constant dense<0.000000e+00> : vector<16x16xf32>
    %99 = tpu.matmul %9, %98, %cst_61 {dimension_numbers = #tpu.dot_dimension_numbers<[1], [0], [0], [1], [0, 0, 1, 1], [], []>} : vector<16x48xf32>, vector<48x16xf32>, vector<16x16xf32> -> vector<16x16xf32>
    %c8_i32_62 = arith.constant 8 : i32
    %100 = tpu.dynamic_rotate %99 by %c8_i32_62 dim 0 : vector<16x16xf32>, i32 -> vector<16x16xf32>
    %101 = tpu.concatenate %99, %99, %99, %99, %100, %100, %100, %100 in 1 : vector<16x16xf32>, vector<16x16xf32>, vector<16x16xf32>, vector<16x16xf32>, vector<16x16xf32>, vector<16x16xf32>, vector<16x16xf32>, vector<16x16xf32> -> vector<16x128xf32>
    %102 = arith.mulf %101, %11 : vector<16x128xf32>
    %c3 = arith.constant 3 : index
    %c0_63 = arith.constant 0 : index
    %c0_64 = arith.constant 0 : index
    %103 = vector.load %arg8[%c3, %c0_63, %c0_64] : memref<4x128x16xf32, #tpu.memory_space<vmem>>, vector<1x128x16xf32>
    %104 = vector.shape_cast %103 : vector<1x128x16xf32> to vector<128x16xf32>
    %cst_65 = arith.constant dense<0.000000e+00> : vector<16x16xf32>
    %105 = tpu.matmul %102, %104, %cst_65 {dimension_numbers = #tpu.dot_dimension_numbers<[1], [0], [0], [1], [0, 0, 1, 1], [], []>} : vector<16x128xf32>, vector<128x16xf32>, vector<16x16xf32> -> vector<16x16xf32>
    %106 = tpu.concatenate %10, %98 in 1 : vector<48x16xf32>, vector<48x16xf32> -> vector<48x32xf32>
    %c3_66 = arith.constant 3 : index
    %c0_67 = arith.constant 0 : index
    %c0_68 = arith.constant 0 : index
    %107 = vector.load %arg9[%c3_66, %c0_67, %c0_68] : memref<4x16x16xf32, #tpu.memory_space<vmem>>, vector<1x16x16xf32>
    %108 = vector.shape_cast %107 : vector<1x16x16xf32> to vector<16x16xf32>
    %109 = tpu.concatenate %105, %108 in 0 : vector<16x16xf32>, vector<16x16xf32> -> vector<32x16xf32>
    %cst_69 = arith.constant dense<0.000000e+00> : vector<48x16xf32>
    %110 = tpu.matmul %106, %109, %cst_69 {dimension_numbers = #tpu.dot_dimension_numbers<[1], [0], [0], [1], [0, 0, 1, 1], [], []>} : vector<48x32xf32>, vector<32x16xf32>, vector<48x16xf32> -> vector<48x16xf32>
    %c3_70 = arith.constant 3 : index
    %c0_71 = arith.constant 0 : index
    %c0_72 = arith.constant 0 : index
    %111 = vector.load %arg10[%c3_70, %c0_71, %c0_72] : memref<4x1x16xf32, #tpu.memory_space<vmem>>, vector<1x1x16xf32>
    %112 = vector.shape_cast %111 : vector<1x1x16xf32> to vector<1x16xf32>
    %113 = vector.broadcast %112 : vector<1x16xf32> to vector<48x16xf32>
    %114 = arith.addf %110, %113 : vector<48x16xf32>
    %c0_73 = arith.constant 0 : index
    %c0_74 = arith.constant 0 : index
    %115 = vector.load %arg11[%c0_73, %c0_74] : memref<16x16xf32, #tpu.memory_space<vmem>>, vector<16x16xf32>
    %cst_75 = arith.constant dense<0.000000e+00> : vector<48x16xf32>
    %116 = tpu.matmul %114, %115, %cst_75 {dimension_numbers = #tpu.dot_dimension_numbers<[1], [0], [0], [1], [0, 0, 1, 1], [], []>} : vector<48x16xf32>, vector<16x16xf32>, vector<48x16xf32> -> vector<48x16xf32>
    %c0_76 = arith.constant 0 : index
    %c0_77 = arith.constant 0 : index
    %117 = vector.load %arg12[%c0_76, %c0_77] : memref<1x16xf32, #tpu.memory_space<vmem>>, vector<1x16xf32>
    %118 = vector.broadcast %117 : vector<1x16xf32> to vector<48x16xf32>
    %119 = arith.addf %116, %118 : vector<48x16xf32>
    %cst_78 = arith.constant 5.000000e-01 : f32
    %120 = vector.broadcast %cst_78 : f32 to vector<48x16xf32>
    %121 = arith.mulf %120, %119 : vector<48x16xf32>
    %cst_79 = arith.constant 4.471500e-02 : f32
    %122 = vector.broadcast %cst_79 : f32 to vector<48x16xf32>
    %123 = arith.mulf %122, %119 : vector<48x16xf32>
    %124 = arith.mulf %123, %119 : vector<48x16xf32>
    %125 = arith.mulf %124, %119 : vector<48x16xf32>
    %126 = arith.addf %119, %125 : vector<48x16xf32>
    %cst_80 = arith.constant 0.797884583 : f32
    %127 = vector.broadcast %cst_80 : f32 to vector<48x16xf32>
    %128 = arith.mulf %127, %126 : vector<48x16xf32>
    %129 = math.tanh %128 : vector<48x16xf32>
    %cst_81 = arith.constant 1.000000e+00 : f32
    %130 = vector.broadcast %cst_81 : f32 to vector<48x16xf32>
    %131 = arith.addf %130, %129 : vector<48x16xf32>
    %132 = arith.mulf %121, %131 : vector<48x16xf32>
    %c0_82 = arith.constant 0 : index
    %c0_83 = arith.constant 0 : index
    %133 = vector.load %arg13[%c0_82, %c0_83] : memref<16x128xf32, #tpu.memory_space<vmem>>, vector<16x128xf32>
    %cst_84 = arith.constant dense<0.000000e+00> : vector<48x128xf32>
    %134 = tpu.matmul %132, %133, %cst_84 {dimension_numbers = #tpu.dot_dimension_numbers<[1], [0], [0], [1], [0, 0, 1, 1], [], []>} : vector<48x16xf32>, vector<16x128xf32>, vector<48x128xf32> -> vector<48x128xf32>
    %c0_85 = arith.constant 0 : index
    %c0_86 = arith.constant 0 : index
    %135 = vector.load %arg14[%c0_85, %c0_86] : memref<1x128xf32, #tpu.memory_space<vmem>>, vector<1x128xf32>
    %136 = vector.broadcast %135 : vector<1x128xf32> to vector<48x128xf32>
    %137 = arith.addf %134, %136 : vector<48x128xf32>
    %c0_87 = arith.constant 0 : index
    %c0_88 = arith.constant 0 : index
    %138 = vector.load %arg15[%c0_87, %c0_88] : memref<48x128xf32, #tpu.memory_space<vmem>>, vector<48x128xf32>
    tpu.vector_store %arg15[%c0_87, %c0_88], %137 {strides = array<i32>} : memref<48x128xf32, #tpu.memory_space<vmem>>, vector<48x128xf32>,
    return
  }
  func.func @transform_0(%arg0: i32) -> (i32, i32) {
    %c0_i32 = arith.constant 0 : i32
    %c0_i32_0 = arith.constant 0 : i32
    return %arg0, %c0_i32 : i32, i32
  }
  func.func @transform_1(%arg0: i32) -> (i32, i32) {
    %c0_i32 = arith.constant 0 : i32
    %c0_i32_0 = arith.constant 0 : i32
    %c0_i32_1 = arith.constant 0 : i32
    return %c0_i32, %c0_i32_0 : i32, i32
  }
  func.func @transform_2(%arg0: i32) -> (i32, i32) {
    %c0_i32 = arith.constant 0 : i32
    %c0_i32_0 = arith.constant 0 : i32
    %c0_i32_1 = arith.constant 0 : i32
    return %c0_i32, %c0_i32_0 : i32, i32
  }
  func.func @transform_3(%arg0: i32) -> (i32, i32) {
    %c0_i32 = arith.constant 0 : i32
    %c0_i32_0 = arith.constant 0 : i32
    %c0_i32_1 = arith.constant 0 : i32
    return %c0_i32, %c0_i32_0 : i32, i32
  }
  func.func @transform_4(%arg0: i32) -> (i32, i32) {
    %c0_i32 = arith.constant 0 : i32
    %c0_i32_0 = arith.constant 0 : i32
    %c0_i32_1 = arith.constant 0 : i32
    return %c0_i32, %c0_i32_0 : i32, i32
  }
  func.func @transform_5(%arg0: i32) -> (i32, i32) {
    %c0_i32 = arith.constant 0 : i32
    %c0_i32_0 = arith.constant 0 : i32
    %c0_i32_1 = arith.constant 0 : i32
    return %c0_i32, %c0_i32_0 : i32, i32
  }
  func.func @transform_6(%arg0: i32) -> (i32, i32) {
    %c0_i32 = arith.constant 0 : i32
    %c0_i32_0 = arith.constant 0 : i32
    %c0_i32_1 = arith.constant 0 : i32
    return %c0_i32, %c0_i32_0 : i32, i32
  }
  func.func @transform_7(%arg0: i32) -> (i32, i32, i32) {
    %c0_i32 = arith.constant 0 : i32
    %c0_i32_0 = arith.constant 0 : i32
    %c0_i32_1 = arith.constant 0 : i32
    %c0_i32_2 = arith.constant 0 : i32
    return %c0_i32, %c0_i32_0, %c0_i32_1 : i32, i32, i32
  }
  func.func @transform_8(%arg0: i32) -> (i32, i32, i32) {
    %c0_i32 = arith.constant 0 : i32
    %c0_i32_0 = arith.constant 0 : i32
    %c0_i32_1 = arith.constant 0 : i32
    %c0_i32_2 = arith.constant 0 : i32
    return %c0_i32, %c0_i32_0, %c0_i32_1 : i32, i32, i32
  }
  func.func @transform_9(%arg0: i32) -> (i32, i32, i32) {
    %c0_i32 = arith.constant 0 : i32
    %c0_i32_0 = arith.constant 0 : i32
    %c0_i32_1 = arith.constant 0 : i32
    %c0_i32_2 = arith.constant 0 : i32
    return %c0_i32, %c0_i32_0, %c0_i32_1 : i32, i32, i32
  }
  func.func @transform_10(%arg0: i32) -> (i32, i32) {
    %c0_i32 = arith.constant 0 : i32
    %c0_i32_0 = arith.constant 0 : i32
    %c0_i32_1 = arith.constant 0 : i32
    return %c0_i32, %c0_i32_0 : i32, i32
  }
  func.func @transform_11(%arg0: i32) -> (i32, i32) {
    %c0_i32 = arith.constant 0 : i32
    %c0_i32_0 = arith.constant 0 : i32
    %c0_i32_1 = arith.constant 0 : i32
    return %c0_i32, %c0_i32_0 : i32, i32
  }
  func.func @transform_12(%arg0: i32) -> (i32, i32) {
    %c0_i32 = arith.constant 0 : i32
    %c0_i32_0 = arith.constant 0 : i32
    %c0_i32_1 = arith.constant 0 : i32
    return %c0_i32, %c0_i32_0 : i32, i32
  }
  func.func @transform_13(%arg0: i32) -> (i32, i32) {
    %c0_i32 = arith.constant 0 : i32
    %c0_i32_0 = arith.constant 0 : i32
    %c0_i32_1 = arith.constant 0 : i32
    return %c0_i32, %c0_i32_0 : i32, i32
  }
  func.func @transform_14(%arg0: i32) -> (i32, i32) {
    %c0_i32 = arith.constant 0 : i32
    %c0_i32_0 = arith.constant 0 : i32
    return %arg0, %c0_i32 : i32, i32
  }
}

</mosaic_0001>

<bundles_post_ra>
// kernel: tpu_custom_call.1
= control target key start
LH: loop header
LB: loop body
LE: loop exit
PB: predicated region body
PF: predicated region fallthrough
CT: control target
= control target key end

     0   :  { %vm81_vm0 = vcmask 1043456   ;;  %vm62_vm1 = vcmask 31744   ;;  %v3148_v4 = vmov 0   ;;  %s3950_s0 = inlined_call_operand.vmem [shape: f32[48,4], index: 0, kind: input, shape index: {}]   ;;  %s3951_s1 = inlined_call_operand.vmem [shape: f32[48,1], index: 1, kind: input, shape index: {}]   ;;  %s3952_s2 = inlined_call_operand.vmem [shape: f32[16,48], index: 2, kind: input, shape index: {}]   ;;  %s3953_s3 = inlined_call_operand.vmem [shape: f32[48,16], index: 3, kind: input, shape index: {}]   ;;  %s3954_s4 = inlined_call_operand.vmem [shape: f32[16,128], index: 4, kind: input, shape index: {}]   ;;  %s3955_s5 = inlined_call_operand.vmem [shape: f32[4,16], index: 5, kind: input, shape index: {}]   ;;  %s3956_s6 = inlined_call_operand.vmem [shape: f32[1,16], index: 6, kind: input, shape index: {}]   ;;  %s3957_s7 = inlined_call_operand.vmem [shape: f32[4,128,16], index: 7, kind: input, shape index: {}]   ;;  %s3958_s8 = inlined_call_operand.vmem [shape: f32[4,16,16], index: 8, kind: input, shape index: {}]   ;;  %s3959_s9 = inlined_call_operand.vmem [shape: f32[4,1,16], index: 9, kind: input, shape index: {}]   ;;  %s3960_s10 = inlined_call_operand.vmem [shape: f32[16,16], index: 10, kind: input, shape index: {}]   ;;  %s3961_s11 = inlined_call_operand.vmem [shape: f32[1,16], index: 11, kind: input, shape index: {}]   ;;  %s3962_s12 = inlined_call_operand.vmem [shape: f32[16,128], index: 12, kind: input, shape index: {}]   ;;  %s3963_s13 = inlined_call_operand.vmem [shape: f32[1,128], index: 13, kind: input, shape index: {}]   ;;  %s3964_s14 = inlined_call_operand.hbm [shape: f32[48,128], index: 14, kind: output, shape index: {}]  }
   0x1   :  { %v54_v0 = vld [vmem:[%s3955_s5] sm:$0xf]  ;;  %v49_v2 = vld [vmem:[%s3950_s0 + $0x8] sm:$0xff]  ;;  %v50_v3 = vld [vmem:[%s3950_s0 + $0x10] sm:$0xff]  ;;  %3064 = vset.pattern.permute.xlu0 %v3148_v4  ;;  %3065 = vset.pattern.permute.xlu1 %v3148_v4 }
   0x2   :  { %v48_v1 = vld [vmem:[%s3950_s0] sm:$0xff]  ;;  %2530 = vmatprep.subr.msk.mxu0 %vm81_vm0, %v54_v0  ;;  %v182_v6 = vld [vmem:[%s3951_s1 + $0x10] sm:$0xff]  ;;  %v51_v7 = vld [vmem:[%s3950_s0 + $0x18] sm:$0xff] }
   0x3   :  { %2532 = vmatprep.mubr.msk.f32.mxu0 %vm62_vm1, %v48_v1  ;;  %2531 = vmatpush3.msk.msra.mxu0 %vm81_vm0, %v54_v0  ;;  %v180_v5 = vld [vmem:[%s3951_s1] sm:$0xff]  ;;  %v181_v8 = vld [vmem:[%s3951_s1 + $0x8] sm:$0xff] }
   0x4   :  { %2533 = vmatmul.mubr.msk.f32.vlgmr.msra.gmra.mrb[0].mxu0 %vm62_vm1, %v49_v2  ;;  %188 = vperm.xlu0 %3064, %v180_v5  }
   0x5   :  { %2535 = vmatprep.mubr.msk.f32.mxu0 %vm62_vm1, %v50_v3 }
   0x6   :  { %19 = vsyncpa [#allocation3], 0  ;;  %v52_v9 = vld [vmem:[%s3950_s0 + $0x20] sm:$0xff]  ;;  %198 = vperm.xlu1 %3065, %v182_v6   ;;  %v183_v10 = vld [vmem:[%s3951_s1 + $0x18] sm:$0xff]  ;;  %vm232_vm2 = vcmask 392192   ;;  %s3149_s24 = smov 64  }
   0x7   :  { %v53_v11 = vld [vmem:[%s3950_s0 + $0x28] sm:$0xff]  ;;  %v184_v12 = vld [vmem:[%s3951_s1 + $0x20] sm:$0xff]  ;;  %v382_v47 = vld [vmem:[%s3957_s7 + $0x10] sm:$0xff]  ;;  %s3150_s25 = smov 16   ;;  %s3151_s30 = smov 80   ;;  %vm358_vm3 = vcmask 130048  }
   0x8   :  { %2536 = vmatmul.mubr.msk.f32.gmra.mrb[2].mxu0 %vm62_vm1, %v51_v7  ;;  %193 = vperm.xlu0 %3064, %v181_v8   ;;  %v185_v13 = vld [vmem:[%s3951_s1 + $0x28] sm:$0xff]  ;;  %v3282_v14 = vld [vmem:[%s3952_s2] sm:$0xff]  ;;  %v383_v48 = vld [vmem:[%s3957_s7 + $0x18] sm:$0xff]  ;;  %s3152_s15 = smov 32   ;;  %s3153_s20 = smov 96   ;;  %vm361_vm4 = vcmask 261120  }
   0x9   :  { %2538 = vmatprep.mubr.msk.f32.mxu0 %vm62_vm1, %v52_v9  ;;  %2553 = vmatprep.mubr.msk.f32.mxu1 %vm232_vm2, %v3282_v14  ;;  %v2248_v17 = vld [vmem:[%s3956_s6] ss:$0 sm:$0xff]  ;;  %v3310_v43 = vld [vmem:[%s3952_s2 + $0x8] sm:$0xff]  ;;  %v2851_v49 = vpack.c.bf16 %v383_v48, %v382_v47  ;;  %v386_v53 = vld [vmem:[%s3957_s7 + $0x30] sm:$0xff]  ;;  %s3154_s5 = smov 48   ;;  %s3155_s1 = smov 112  }
   0xa   :  { %203 = vperm.xlu1 %3065, %v183_v10   ;;  %v380_v44 = vld [vmem:[%s3957_s7] sm:$0xff]  ;;  %v381_v45 = vld [vmem:[%s3957_s7 + $0x8] sm:$0xff]  ;;  %v387_v54 = vld [vmem:[%s3957_s7 + $0x38] sm:$0xff]  ;;  %vm366_vm5 = vcmask 523264   ;;  %vm369_vm6 = vcmask 654336   ;;  %vm372_vm7 = vcmask 785408  }
   0xb   :  { %v2847_v46 = vpack.c.bf16 %v381_v45, %v380_v44  ;;  %v384_v50 = vld [vmem:[%s3957_s7 + $0x20] sm:$0xff]  ;;  %v385_v51 = vld [vmem:[%s3957_s7 + $0x28] sm:$0xff]  ;;  %v2859_v55 = vpack.c.bf16 %v387_v54, %v386_v53  ;;  %v390_v61 = vld [vmem:[%s3957_s7 + $0x50] sm:$0xff]  ;;  %vm375_vm8 = vcmask 916480  }
   0xc   :  { %2539 = vmatmul.mubr.msk.f32.gmra.mrb[4].mxu0 %vm62_vm1, %v53_v11  ;;  %208 = vperm.xlu0 %3064, %v184_v12   ;;  %v2855_v52 = vpack.c.bf16 %v385_v51, %v384_v50  ;;  %v388_v56 = vld [vmem:[%s3957_s7 + $0x40] sm:$0xff]  ;;  %v389_v57 = vld [vmem:[%s3957_s7 + $0x48] sm:$0xff]  ;;  %v391_v62 = vld [vmem:[%s3957_s7 + $0x58] sm:$0xff] }
   0xd   :  { %2848 = vmatprep.subr.bf16.mxu0 %v2847_v46  ;;  %v2863_v58 = vpack.c.bf16 %v389_v57, %v388_v56  ;;  %v2867_v63 = vpack.c.bf16 %v391_v62, %v390_v61  ;;  %v392_v0 = vld [vmem:[%s3957_s7 + $0x60] sm:$0xff]  ;;  %v393_v1 = vld [vmem:[%s3957_s7 + $0x68] sm:$0xff]  ;;  %v394_v3 = vld [vmem:[%s3957_s7 + $0x70] sm:$0xff] }
   0xe   :  { %213 = vperm.xlu1 %3065, %v185_v13   ;;  %2850 = vmatpush3.bf16.msra.mxu0 %v2847_v46  ;;  %v2871_v2 = vpack.c.bf16 %v393_v1, %v392_v0  ;;  %v395_v4 = vld [vmem:[%s3957_s7 + $0x78] sm:$0xff]  ;;  %v502_v44 = vld [vmem:[%s3958_s8 + $0x8] sm:$0xff]  ;;  %v3451_v57 = vld [vmem:[%s3953_s3 + $0x20] sm:$0xff] }
   0xf   :  { %2852 = vmatprep.subr.bf16.mxu0 %v2851_v49  ;;  %v2875_v5 = vpack.c.bf16 %v395_v4, %v394_v3  ;;  %v3431_v51 = vld [vmem:[%s3953_s3 + $0x8] sm:$0xff]  ;;  %v2258_v0 = vld [vmem:[%s3959_s9] ss:$0 sm:$0xff] }
  0x12   :  { %2854 = vmatpush3.bf16.msra.mxu0 %v2851_v49 }
  0x13   :  { %2856 = vmatprep.subr.bf16.mxu0 %v2855_v52 }
  0x16   :  { %2858 = vmatpush3.bf16.msra.mxu0 %v2855_v52  ;;  %v3436_v52 = vld [vmem:[%s3953_s3 + $0x10] sm:$0xff] }
  0x17   :  { %2860 = vmatprep.subr.bf16.mxu0 %v2859_v55 }
  0x1a   :  { %2862 = vmatpush3.bf16.msra.mxu0 %v2859_v55  ;;  %v3443_v55 = vld [vmem:[%s3953_s3 + $0x18] sm:$0xff] }
  0x1b   :  { %2864 = vmatprep.subr.bf16.mxu0 %v2863_v58 }
  0x1e   :  { %2866 = vmatpush3.bf16.msra.mxu0 %v2863_v58 }
  0x1f   :  { %2868 = vmatprep.subr.bf16.mxu0 %v2867_v63 }
  0x22   :  { %2870 = vmatpush3.bf16.msra.mxu0 %v2867_v63 }
  0x23   :  { %2872 = vmatprep.subr.bf16.mxu0 %v2871_v2 }
  0x26   :  { %2874 = vmatpush3.bf16.msra.mxu0 %v2871_v2 }
  0x27   :  { %2876 = vmatprep.subr.bf16.mxu0 %v2875_v5 }
  0x2a   :  { %2878 = vmatpush3.bf16.msra.mxu0 %v2875_v5 }
  0x83   :  { %v189_v15 = vpop.permute.xlu0 %188 }
  0x85   :  { %v199_v16 = vpop.permute.xlu1 %198 }
  0x87   :  { %v194_v21 = vpop.permute.xlu0 %193 }
  0x89   :  { %v204_v24 = vpop.permute.xlu1 %203 }
  0x8b   :  { %v209_v39 = vpop.permute.xlu0 %208 }
  0x8d   :  { %v214_v36 = vpop.permute.xlu1 %213 }
  0xd7   :  { %v2534_v18 = vpop.f32.mrb[0].mxu0 }
  0xd8   :  { %v157_v19 = vadd.f32 %v2534_v18, %v2248_v17  ;;  %v151_v20 = vpop.f32.mrb[1].mxu0 }
  0xd9   :  { %v152_v22 = vadd.f32 %v2248_v17, %v151_v20 }
  0xda   :  { %v3289_v23 = vmul.f32 %v194_v21, %v157_v19 }
  0xdb   :  { %v3291_v25 = vmul.f32 %v189_v15, %v152_v22  ;;  %v2537_v26 = vpop.f32.mrb[2].mxu0 }
  0xdc   :  { %v167_v27 = vadd.f32 %v2537_v26, %v2248_v17  ;;  %v161_v28 = vpop.f32.mrb[3].mxu0 }
  0xdd   :  { %v162_v29 = vadd.f32 %v2248_v17, %v161_v28  ;;  %v2835_v30 = vpack.c.bf16 %v3289_v23, %v3291_v25  ;;  %v3400_v28 = vld [vmem:[%s3954_s4 + $0x8] sm:$0xff] }
  0xde   :  { %v3295_v31 = vmul.f32 %v204_v24, %v167_v27 }
  0xdf   :  { %v3297_v32 = vmul.f32 %v199_v16, %v162_v29  ;;  %v2540_v33 = vpop.f32.mrb[4].mxu0  ;;  %2836 = vmatprep.subr.bf16.mxu1 %v2835_v30  ;;  %v3405_v29 = vld [vmem:[%s3954_s4] sm:$0xff] }
  0xe0   :  { %v177_v34 = vadd.f32 %v2540_v33, %v2248_v17  ;;  %v171_v35 = vpop.f32.mrb[5].mxu0  ;;  %2838 = vmatpush3.bf16.msra.mxu1 %v2835_v30 }
  0xe1   :  { %v172_v37 = vadd.f32 %v2248_v17, %v171_v35  ;;  %v2839_v38 = vpack.c.bf16 %v3295_v31, %v3297_v32 }
  0xe2   :  { %v3301_v40 = vmul.f32 %v214_v36, %v177_v34 }
  0xe3   :  { %v3303_v41 = vmul.f32 %v209_v39, %v172_v37  ;;  %2840 = vmatprep.subr.bf16.mxu1 %v2839_v38  ;;  %v3417_v39 = vld [vmem:[%s3953_s3] sm:$0xff] }
  0xe4   :  { %2842 = vmatpush3.bf16.msra.mxu1 %v2839_v38 }
  0xe5   :  { %v2843_v42 = vpack.c.bf16 %v3301_v40, %v3303_v41 }
  0xe7   :  { %2844 = vmatprep.subr.bf16.mxu1 %v2843_v42 }
  0xe8   :  { %2846 = vmatpush3.bf16.msra.mxu1 %v2843_v42  ;;  %v501_v42 = vld [vmem:[%s3958_s8] sm:$0xff] }
  0xe9   :  { %v2883_v48 = vpack.c.bf16 %v502_v44, %v501_v42 }
  0xeb   :  { %2554 = vmatmul.mubr.msk.f32.vlgmr.msra.gmra.mrb[0].mxu1 %vm232_vm2, %v3310_v43 }
 0x1be   :  { %v2555_v59 = vpop.f32.mrb[0].mxu1 }
 0x1bf   :  { %334 = vrot.lane.b32.xlu0 %v2555_v59, %s3149_s24  ;;  %318 = vrot.lane.b32.xlu1 %v2555_v59, %s3150_s25  ;;  %v305_v60 = vpop.f32.mrb[1].mxu1 }
 0x1c3   :  { %340 = vrot.lane.b32.xlu0 %v2555_v59, %s3151_s30  ;;  %324 = vrot.lane.b32.xlu1 %v2555_v59, %s3152_s15 }
 0x1c7   :  { %346 = vrot.lane.b32.xlu0 %v2555_v59, %s3153_s20  ;;  %330 = vrot.lane.b32.xlu1 %v2555_v59, %s3154_s5 }
 0x1cb   :  { %336 = vrot.lane.b32.xlu1 %v305_v60, %s3149_s24  ;;  %316 = vrot.lane.b32.xlu0 %v305_v60, %s3150_s25 }
 0x1cf   :  { %342 = vrot.lane.b32.xlu1 %v305_v60, %s3151_s30  ;;  %322 = vrot.lane.b32.xlu0 %v305_v60, %s3152_s15 }
 0x1d3   :  { %348 = vrot.lane.b32.xlu1 %v305_v60, %s3153_s20  ;;  %328 = vrot.lane.b32.xlu0 %v305_v60, %s3154_s5 }
 0x1d7   :  { %354 = vrot.lane.b32.xlu1 %v305_v60, %s3155_s1  ;;  %352 = vrot.lane.b32.xlu0 %v2555_v59, %s3155_s1 }
 0x1db   :  { %479 = vrot.lane.b32.xlu1 %v3289_v23, %s3150_s25  ;;  %477 = vrot.lane.b32.xlu0 %v3291_v25, %s3150_s25 }
 0x1df   :  { %483 = vrot.lane.b32.xlu1 %v3295_v31, %s3150_s25  ;;  %481 = vrot.lane.b32.xlu0 %v3297_v32, %s3150_s25 }
 0x1e3   :  { %487 = vrot.lane.b32.xlu1 %v3301_v40, %s3150_s25  ;;  %485 = vrot.lane.b32.xlu0 %v3303_v41, %s3150_s25 }
 0x231   :  { %v335_v6 = vpop.permute.xlu0 %334  ;;  %v319_v7 = vpop.permute.xlu1 %318 }
 0x232   :  { %v360_v17 = vsel %vm358_vm3, %v2555_v59, %v319_v7 }
 0x235   :  { %v341_v8 = vpop.permute.xlu0 %340  ;;  %v325_v9 = vpop.permute.xlu1 %324 }
 0x236   :  { %v363_v19 = vsel %vm361_vm4, %v360_v17, %v325_v9 }
 0x239   :  { %v347_v10 = vpop.permute.xlu0 %346  ;;  %v331_v11 = vpop.permute.xlu1 %330 }
 0x23a   :  { %v365_v23 = vsel %vm232_vm2, %v363_v19, %v331_v11 }
 0x23d   :  { %v337_v12 = vpop.permute.xlu1 %336  ;;  %v317_v13 = vpop.permute.xlu0 %316 }
 0x23e   :  { %v359_v18 = vsel %vm358_vm3, %v305_v60, %v317_v13  ;;  %v368_v25 = vsel %vm366_vm5, %v365_v23, %v337_v12  ;;  %v3459_v60 = vld [vmem:[%s3953_s3 + $0x28] sm:$0xff] }
 0x241   :  { %v343_v15 = vpop.permute.xlu1 %342  ;;  %v323_v16 = vpop.permute.xlu0 %322 }
 0x242   :  { %v362_v20 = vsel %vm361_vm4, %v359_v18, %v323_v16  ;;  %v371_v27 = vsel %vm369_vm6, %v368_v25, %v343_v15 }
 0x245   :  { %v349_v21 = vpop.permute.xlu1 %348  ;;  %v329_v22 = vpop.permute.xlu0 %328 }
 0x246   :  { %v364_v24 = vsel %vm232_vm2, %v362_v20, %v329_v22  ;;  %v374_v31 = vsel %vm372_vm7, %v371_v27, %v349_v21 }
 0x247   :  { %v367_v26 = vsel %vm366_vm5, %v364_v24, %v335_v6 }
 0x248   :  { %v370_v30 = vsel %vm369_vm6, %v367_v26, %v341_v8 }
 0x249   :  { %v355_v32 = vpop.permute.xlu1 %354  ;;  %v373_v33 = vsel %vm372_vm7, %v370_v30, %v347_v10  ;;  %v353_v34 = vpop.permute.xlu0 %352 }
 0x24a   :  { %v377_v35 = vsel %vm375_vm8, %v374_v31, %v355_v32  ;;  %v376_v36 = vsel %vm375_vm8, %v373_v33, %v353_v34 }
 0x24b   :  { %v379_v37 = vmul.f32 %v377_v35, %v3400_v28  ;;  %v378_v38 = vmul.f32 %v376_v36, %v3405_v29 }
 0x24d   :  { %2588 = vmatprep.mubr.f32.mxu0 %v378_v38  ;;  %v478_v40 = vpop.permute.xlu0 %477  ;;  %v480_v49 = vpop.permute.xlu1 %479 }
 0x24e   :  { %v495_v41 = vsel %vm358_vm3, %v3417_v39, %v478_v40  ;;  %2589 = vmatmul.mubr.f32.vlgmr.msra.gmra.mrb[6].mxu0 %v379_v37  ;;  %v496_v54 = vsel %vm358_vm3, %v3431_v51, %v480_v49 }
 0x24f   :  { %2599 = vmatprep.mubr.msk.f32.mxu1 %vm361_vm4, %v495_v41 }
 0x251   :  { %v482_v50 = vpop.permute.xlu0 %481  ;;  %v484_v53 = vpop.permute.xlu1 %483 }
 0x252   :  { %v497_v56 = vsel %vm358_vm3, %v3436_v52, %v482_v50  ;;  %v498_v59 = vsel %vm358_vm3, %v3443_v55, %v484_v53 }
 0x255   :  { %v486_v58 = vpop.permute.xlu0 %485  ;;  %v488_v61 = vpop.permute.xlu1 %487 }
 0x256   :  { %v499_v62 = vsel %vm358_vm3, %v3451_v57, %v486_v58  ;;  %v500_v63 = vsel %vm358_vm3, %v3459_v60, %v488_v61 }
 0x321   :  { %v2590_v45 = vpop.f32.mrb[6].mxu0 }
 0x322   :  { %v462_v46 = vpop.f32.mrb[7].mxu0 }
 0x323   :  { %v2879_v47 = vpack.c.bf16 %v2590_v45, %v462_v46 }
 0x325   :  { %2880 = vmatprep.subr.bf16.mxu1 %v2879_v47 }
 0x326   :  { %2882 = vmatpush3.bf16.msra.mxu1 %v2879_v47 }
 0x327   :  { %2884 = vmatprep.subr.bf16.mxu1 %v2883_v48 }
 0x32a   :  { %2886 = vmatpush3.bf16.msra.mxu1 %v2883_v48 }
 0x32d   :  { %2600 = vmatmul.mubr.msk.f32.vlgmr.msra.gmra.mrb[2].mxu1 %vm361_vm4, %v496_v54 }
 0x32e   :  { %2602 = vmatprep.mubr.msk.f32.mxu1 %vm361_vm4, %v497_v56 }
 0x331   :  { %2603 = vmatmul.mubr.msk.f32.gmra.mrb[4].mxu1 %vm361_vm4, %v498_v59 }
 0x332   :  { %2605 = vmatprep.mubr.msk.f32.mxu1 %vm361_vm4, %v499_v62 }
 0x335   :  { %2606 = vmatmul.mubr.msk.f32.gmra.mrb[6].mxu1 %vm361_vm4, %v500_v63 }
 0x336   :  { %2620 = vmatprep.mubr.msk.f32.mxu1 %vm232_vm2, %v3282_v14 }
 0x400   :  { %v2601_v1 = vpop.f32.mrb[2].mxu1 }
 0x401   :  { %v600_v2 = vadd.f32 %v2601_v1, %v2258_v0  ;;  %v594_v3 = vpop.f32.mrb[3].mxu1 }
 0x402   :  { %v595_v4 = vadd.f32 %v2258_v0, %v594_v3 }
 0x403   :  { %v630_v5 = vmul.f32 0.044715, %v600_v2  ;;  %v624_v50 = vmul.f32 0.5, %v600_v2 }
 0x404   :  { %v629_v6 = vmul.f32 0.044715, %v595_v4  ;;  %v2604_v7 = vpop.f32.mrb[4].mxu1  ;;  %v623_v54 = vmul.f32 0.5, %v595_v4 }
 0x405   :  { %v636_v8 = vmul.f32 %v630_v5, %v600_v2  ;;  %v610_v9 = vadd.f32 %v2604_v7, %v2258_v0  ;;  %v604_v10 = vpop.f32.mrb[5].mxu1 }
 0x406   :  { %v635_v11 = vmul.f32 %v629_v6, %v595_v4  ;;  %v605_v12 = vadd.f32 %v2258_v0, %v604_v10 }
 0x407   :  { %v642_v13 = vmul.f32 %v636_v8, %v600_v2  ;;  %v632_v15 = vmul.f32 0.044715, %v610_v9  ;;  %v626_v63 = vmul.f32 0.5, %v610_v9 }
 0x408   :  { %v641_v16 = vmul.f32 %v635_v11, %v595_v4  ;;  %v631_v17 = vmul.f32 0.044715, %v605_v12  ;;  %v2607_v18 = vpop.f32.mrb[6].mxu1  ;;  %v625_v3 = vmul.f32 0.5, %v605_v12 }
 0x409   :  { %v638_v19 = vmul.f32 %v632_v15, %v610_v9  ;;  %v620_v20 = vadd.f32 %v2607_v18, %v2258_v0  ;;  %v614_v21 = vpop.f32.mrb[7].mxu1  ;;  %v648_v22 = vadd.f32 %v642_v13, %v600_v2  ;;  %v2268_v18 = vld [vmem:[%s3957_s7 + $0x88] sm:$0xff] }
 0x40a   :  { %v637_v23 = vmul.f32 %v631_v17, %v605_v12  ;;  %v615_v24 = vadd.f32 %v2258_v0, %v614_v21  ;;  %v647_v25 = vadd.f32 %v641_v16, %v595_v4  ;;  %v2267_v17 = vld [vmem:[%s3957_s7 + $0x80] sm:$0xff]  ;;  %v2270_v21 = vld [vmem:[%s3957_s7 + $0x98] sm:$0xff] }
 0x40b   :  { %v644_v26 = vmul.f32 %v638_v19, %v610_v9  ;;  %v634_v27 = vmul.f32 0.044715, %v620_v20  ;;  %v654_v30 = vmul.f32 0.7978846, %v648_v22  ;;  %v628_v8 = vmul.f32 0.5, %v620_v20 }
 0x40c   :  { %v643_v31 = vmul.f32 %v637_v23, %v605_v12  ;;  %v633_v32 = vmul.f32 0.044715, %v615_v24  ;;  %v653_v33 = vmul.f32 0.7978846, %v647_v25  ;;  %v2899_v19 = vpack.c.bf16 %v2268_v18, %v2267_v17  ;;  %v2271_v23 = vld [vmem:[%s3957_s7 + $0xa0] sm:$0xff] }
 0x40d   :  { %v640_v34 = vmul.f32 %v634_v27, %v620_v20  ;;  %3066 = vtanh.f32 %v654_v30  ;;  %v650_v35 = vadd.f32 %v644_v26, %v610_v9  ;;  %v627_v9 = vmul.f32 0.5, %v615_v24  ;;  %v2273_v26 = vld [vmem:[%s3957_s7 + $0xb0] sm:$0xff]  ;;  %v2274_v27 = vld [vmem:[%s3957_s7 + $0xb8] sm:$0xff] }
 0x40e   :  { %v639_v36 = vmul.f32 %v633_v32, %v615_v24  ;;  %3068 = vtanh.f32 %v653_v33  ;;  %v649_v37 = vadd.f32 %v643_v31, %v605_v12  ;;  %v2911_v30 = vpack.c.bf16 %v2274_v27, %v2273_v26  ;;  %v2275_v31 = vld [vmem:[%s3957_s7 + $0xc0] sm:$0xff]  ;;  %v2276_v32 = vld [vmem:[%s3957_s7 + $0xc8] sm:$0xff] }
 0x40f   :  { %v646_v38 = vmul.f32 %v640_v34, %v620_v20  ;;  %v656_v40 = vmul.f32 0.7978846, %v650_v35  ;;  %v2915_v33 = vpack.c.bf16 %v2276_v32, %v2275_v31 }
 0x410   :  { %v645_v41 = vmul.f32 %v639_v36, %v615_v24  ;;  %v655_v42 = vmul.f32 0.7978846, %v649_v37  ;;  %v2277_v36 = vld [vmem:[%s3957_s7 + $0xd0] sm:$0xff]  ;;  %v2278_v37 = vld [vmem:[%s3957_s7 + $0xd8] sm:$0xff] }
 0x411   :  { %3070 = vtanh.f32 %v656_v40  ;;  %v652_v44 = vadd.f32 %v646_v38, %v620_v20  ;;  %v2269_v20 = vld [vmem:[%s3957_s7 + $0x90] sm:$0xff]  ;;  %v2919_v38 = vpack.c.bf16 %v2278_v37, %v2277_v36  ;;  %v2279_v40 = vld [vmem:[%s3957_s7 + $0xe0] sm:$0xff] }
 0x412   :  { %3072 = vtanh.f32 %v655_v42  ;;  %v651_v45 = vadd.f32 %v645_v41, %v615_v24  ;;  %v2903_v22 = vpack.c.bf16 %v2270_v21, %v2269_v20  ;;  %v2272_v24 = vld [vmem:[%s3957_s7 + $0xa8] sm:$0xff]  ;;  %v2283_v21 = vld [vmem:[%s3958_s8 + $0x10] sm:$0xff] }
 0x413   :  { %v658_v46 = vmul.f32 0.7978846, %v652_v44  ;;  %v2907_v25 = vpack.c.bf16 %v2272_v24, %v2271_v23  ;;  %v2280_v41 = vld [vmem:[%s3957_s7 + $0xe8] sm:$0xff]  ;;  %v2281_v44 = vld [vmem:[%s3957_s7 + $0xf0] sm:$0xff] }
 0x414   :  { %v657_v47 = vmul.f32 0.7978846, %v651_v45  ;;  %v2923_v42 = vpack.c.bf16 %v2280_v41, %v2279_v40  ;;  %v2282_v45 = vld [vmem:[%s3957_s7 + $0xf8] sm:$0xff]  ;;  %v2286_v40 = vld [vmem:[%s3959_s9 + $0x1] ss:$0 sm:$0xff] }
 0x415   :  { %3074 = vtanh.f32 %v658_v46  ;;  %v2927_v46 = vpack.c.bf16 %v2282_v45, %v2281_v44 }
 0x416   :  { %3076 = vtanh.f32 %v657_v47 }
 0x417   :  { %v3067_v48 = vpop.eup %3066 }
 0x418   :  { %v3069_v49 = vpop.eup %3068  ;;  %v666_v53 = vadd.f32 1.0, %v3067_v48 }
 0x419   :  { %v665_v56 = vadd.f32 1.0, %v3069_v49 }
 0x41a   :  { %v3473_v58 = vmul.f32 %v666_v53, %v624_v50 }
 0x41b   :  { %v3071_v59 = vpop.eup %3070  ;;  %v3475_v61 = vmul.f32 %v665_v56, %v623_v54 }
 0x41c   :  { %v3073_v62 = vpop.eup %3072  ;;  %v668_v0 = vadd.f32 1.0, %v3071_v59 }
 0x41d   :  { %v2887_v1 = vpack.c.bf16 %v3473_v58, %v3475_v61  ;;  %v667_v5 = vadd.f32 1.0, %v3073_v62 }
 0x41e   :  { %v3479_v6 = vmul.f32 %v668_v0, %v626_v63 }
 0x41f   :  { %v3075_v7 = vpop.eup %3074  ;;  %2888 = vmatprep.subr.bf16.mxu1 %v2887_v1  ;;  %v3481_v2 = vmul.f32 %v667_v5, %v625_v3 }
 0x420   :  { %v3077_v4 = vpop.eup %3076  ;;  %2890 = vmatpush3.bf16.msra.mxu1 %v2887_v1  ;;  %v670_v10 = vadd.f32 1.0, %v3075_v7 }
 0x421   :  { %v2891_v11 = vpack.c.bf16 %v3479_v6, %v3481_v2  ;;  %v669_v13 = vadd.f32 1.0, %v3077_v4 }
 0x422   :  { %v3485_v15 = vmul.f32 %v670_v10, %v628_v8 }
 0x423   :  { %2892 = vmatprep.subr.bf16.mxu1 %v2891_v11  ;;  %v3487_v12 = vmul.f32 %v669_v13, %v627_v9 }
 0x424   :  { %2894 = vmatpush3.bf16.msra.mxu1 %v2891_v11 }
 0x425   :  { %v2895_v16 = vpack.c.bf16 %v3485_v15, %v3487_v12 }
 0x427   :  { %2896 = vmatprep.subr.bf16.mxu1 %v2895_v16 }
 0x428   :  { %2898 = vmatpush3.bf16.msra.mxu1 %v2895_v16 }
 0x429   :  { %2900 = vmatprep.subr.bf16.mxu1 %v2899_v19 }
 0x42b   :  { %2621 = vmatmul.mubr.msk.f32.vlgmr.msra.gmra.mrb[8].mxu1 %vm232_vm2, %v3310_v43 }
 0x42c   :  { %2902 = vmatpush3.bf16.msra.mxu1 %v2899_v19 }
 0x42d   :  { %2904 = vmatprep.subr.bf16.mxu1 %v2903_v22 }
 0x430   :  { %2906 = vmatpush3.bf16.msra.mxu1 %v2903_v22  ;;  %v2284_v22 = vld [vmem:[%s3958_s8 + $0x18] sm:$0xff] }
 0x431   :  { %2908 = vmatprep.subr.bf16.mxu1 %v2907_v25  ;;  %v2935_v26 = vpack.c.bf16 %v2284_v22, %v2283_v21 }
 0x434   :  { %2910 = vmatpush3.bf16.msra.mxu1 %v2907_v25 }
 0x435   :  { %2912 = vmatprep.subr.bf16.mxu1 %v2911_v30 }
 0x438   :  { %2914 = vmatpush3.bf16.msra.mxu1 %v2911_v30 }
 0x439   :  { %2916 = vmatprep.subr.bf16.mxu1 %v2915_v33 }
 0x43c   :  { %2918 = vmatpush3.bf16.msra.mxu1 %v2915_v33 }
 0x43d   :  { %2920 = vmatprep.subr.bf16.mxu1 %v2919_v38 }
 0x440   :  { %2922 = vmatpush3.bf16.msra.mxu1 %v2919_v38 }
 0x441   :  { %2924 = vmatprep.subr.bf16.mxu1 %v2923_v42 }
 0x444   :  { %2926 = vmatpush3.bf16.msra.mxu1 %v2923_v42 }
 0x445   :  { %2928 = vmatprep.subr.bf16.mxu1 %v2927_v46 }
 0x448   :  { %2930 = vmatpush3.bf16.msra.mxu1 %v2927_v46 }
 0x4fe   :  { %v2622_v34 = vpop.f32.mrb[8].mxu1 }
 0x4ff   :  { %772 = vrot.lane.b32.xlu0 %v2622_v34, %s3149_s24  ;;  %756 = vrot.lane.b32.xlu1 %v2622_v34, %s3150_s25  ;;  %v743_v35 = vpop.f32.mrb[9].mxu1 }
 0x503   :  { %778 = vrot.lane.b32.xlu0 %v2622_v34, %s3151_s30  ;;  %762 = vrot.lane.b32.xlu1 %v2622_v34, %s3152_s15 }
 0x507   :  { %784 = vrot.lane.b32.xlu0 %v2622_v34, %s3153_s20  ;;  %768 = vrot.lane.b32.xlu1 %v2622_v34, %s3154_s5 }
 0x50b   :  { %774 = vrot.lane.b32.xlu1 %v743_v35, %s3149_s24  ;;  %754 = vrot.lane.b32.xlu0 %v743_v35, %s3150_s25 }
 0x50f   :  { %780 = vrot.lane.b32.xlu1 %v743_v35, %s3151_s30  ;;  %760 = vrot.lane.b32.xlu0 %v743_v35, %s3152_s15 }
 0x513   :  { %786 = vrot.lane.b32.xlu1 %v743_v35, %s3153_s20  ;;  %766 = vrot.lane.b32.xlu0 %v743_v35, %s3154_s5 }
 0x517   :  { %792 = vrot.lane.b32.xlu1 %v743_v35, %s3155_s1  ;;  %790 = vrot.lane.b32.xlu0 %v2622_v34, %s3155_s1 }
 0x51b   :  { %912 = vrot.lane.b32.xlu1 %v3473_v58, %s3150_s25  ;;  %910 = vrot.lane.b32.xlu0 %v3475_v61, %s3150_s25 }
 0x51f   :  { %916 = vrot.lane.b32.xlu1 %v3479_v6, %s3150_s25  ;;  %914 = vrot.lane.b32.xlu0 %v3481_v2, %s3150_s25 }
 0x523   :  { %920 = vrot.lane.b32.xlu1 %v3485_v15, %s3150_s25  ;;  %918 = vrot.lane.b32.xlu0 %v3487_v12, %s3150_s25 }
 0x571   :  { %v773_v47 = vpop.permute.xlu0 %772  ;;  %v757_v48 = vpop.permute.xlu1 %756 }
 0x572   :  { %v797_v62 = vsel %vm358_vm3, %v2622_v34, %v757_v48 }
 0x575   :  { %v779_v49 = vpop.permute.xlu0 %778  ;;  %v763_v50 = vpop.permute.xlu1 %762 }
 0x576   :  { %v799_v0 = vsel %vm361_vm4, %v797_v62, %v763_v50 }
 0x579   :  { %v785_v53 = vpop.permute.xlu0 %784  ;;  %v769_v54 = vpop.permute.xlu1 %768 }
 0x57a   :  { %v801_v6 = vsel %vm232_vm2, %v799_v0, %v769_v54 }
 0x57d   :  { %v775_v56 = vpop.permute.xlu1 %774  ;;  %v755_v58 = vpop.permute.xlu0 %754 }
 0x57e   :  { %v796_v63 = vsel %vm358_vm3, %v743_v35, %v755_v58  ;;  %v803_v2 = vsel %vm366_vm5, %v801_v6, %v775_v56 }
 0x581   :  { %v781_v59 = vpop.permute.xlu1 %780  ;;  %v761_v61 = vpop.permute.xlu0 %760 }
 0x582   :  { %v798_v1 = vsel %vm361_vm4, %v796_v63, %v761_v61  ;;  %v805_v8 = vsel %vm369_vm6, %v803_v2, %v781_v59 }
 0x585   :  { %v787_v3 = vpop.permute.xlu1 %786  ;;  %v767_v5 = vpop.permute.xlu0 %766 }
 0x586   :  { %v800_v7 = vsel %vm232_vm2, %v798_v1, %v767_v5  ;;  %v807_v11 = vsel %vm372_vm7, %v805_v8, %v787_v3 }
 0x587   :  { %v802_v4 = vsel %vm366_vm5, %v800_v7, %v773_v47 }
 0x588   :  { %v804_v10 = vsel %vm369_vm6, %v802_v4, %v779_v49 }
 0x589   :  { %v793_v9 = vpop.permute.xlu1 %792  ;;  %v806_v13 = vsel %vm372_vm7, %v804_v10, %v785_v53  ;;  %v791_v15 = vpop.permute.xlu0 %790 }
 0x58a   :  { %v809_v12 = vsel %vm375_vm8, %v807_v11, %v793_v9  ;;  %v808_v16 = vsel %vm375_vm8, %v806_v13, %v791_v15 }
 0x58b   :  { %v811_v17 = vmul.f32 %v809_v12, %v3400_v28  ;;  %v810_v18 = vmul.f32 %v808_v16, %v3405_v29 }
 0x58d   :  { %2655 = vmatprep.mubr.f32.mxu1 %v810_v18  ;;  %v911_v19 = vpop.permute.xlu0 %910  ;;  %v913_v27 = vpop.permute.xlu1 %912 }
 0x58e   :  { %v928_v20 = vsel %vm358_vm3, %v3417_v39, %v911_v19  ;;  %2656 = vmatmul.mubr.f32.vlgmr.msra.gmra.mrb[10].mxu1 %v811_v17  ;;  %v929_v32 = vsel %vm358_vm3, %v3431_v51, %v913_v27 }
 0x58f   :  { %2666 = vmatprep.mubr.msk.f32.mxu0 %vm361_vm4, %v928_v20 }
 0x591   :  { %v915_v30 = vpop.permute.xlu0 %914  ;;  %v917_v31 = vpop.permute.xlu1 %916 }
 0x592   :  { %v930_v33 = vsel %vm358_vm3, %v3436_v52, %v915_v30  ;;  %v931_v35 = vsel %vm358_vm3, %v3443_v55, %v917_v31 }
 0x595   :  { %v919_v34 = vpop.permute.xlu0 %918  ;;  %v921_v36 = vpop.permute.xlu1 %920 }
 0x596   :  { %v932_v37 = vsel %vm358_vm3, %v3451_v57, %v919_v34  ;;  %v933_v38 = vsel %vm358_vm3, %v3459_v60, %v921_v36 }
 0x661   :  { %v2657_v23 = vpop.f32.mrb[10].mxu1 }
 0x662   :  { %v895_v24 = vpop.f32.mrb[11].mxu1 }
 0x663   :  { %v2931_v25 = vpack.c.bf16 %v2657_v23, %v895_v24 }
 0x665   :  { %2932 = vmatprep.subr.bf16.mxu0 %v2931_v25 }
 0x666   :  { %2934 = vmatpush3.bf16.msra.mxu0 %v2931_v25 }
 0x667   :  { %2936 = vmatprep.subr.bf16.mxu0 %v2935_v26 }
 0x66a   :  { %2938 = vmatpush3.bf16.msra.mxu0 %v2935_v26 }
 0x66d   :  { %2667 = vmatmul.mubr.msk.f32.vlgmr.msra.gmra.mrb[8].mxu0 %vm361_vm4, %v929_v32 }
 0x66e   :  { %2669 = vmatprep.mubr.msk.f32.mxu0 %vm361_vm4, %v930_v33 }
 0x671   :  { %2670 = vmatmul.mubr.msk.f32.gmra.mrb[10].mxu0 %vm361_vm4, %v931_v35 }
 0x672   :  { %2672 = vmatprep.mubr.msk.f32.mxu0 %vm361_vm4, %v932_v37 }
 0x675   :  { %2673 = vmatmul.mubr.msk.f32.gmra.mrb[12].mxu0 %vm361_vm4, %v933_v38 }
 0x676   :  { %2687 = vmatprep.mubr.msk.f32.mxu0 %vm232_vm2, %v3282_v14 }
 0x740   :  { %v2668_v41 = vpop.f32.mrb[8].mxu0 }
 0x741   :  { %v1035_v42 = vadd.f32 %v2668_v41, %v2286_v40  ;;  %v1029_v44 = vpop.f32.mrb[9].mxu0 }
 0x742   :  { %v1030_v45 = vadd.f32 %v2286_v40, %v1029_v44 }
 0x743   :  { %v1065_v46 = vmul.f32 0.044715, %v1035_v42  ;;  %v1059_v27 = vmul.f32 0.5, %v1035_v42 }
 0x744   :  { %v1064_v47 = vmul.f32 0.044715, %v1030_v45  ;;  %v2671_v48 = vpop.f32.mrb[10].mxu0  ;;  %v1058_v31 = vmul.f32 0.5, %v1030_v45 }
 0x745   :  { %v1071_v49 = vmul.f32 %v1065_v46, %v1035_v42  ;;  %v1045_v50 = vadd.f32 %v2671_v48, %v2286_v40  ;;  %v1039_v53 = vpop.f32.mrb[11].mxu0 }
 0x746   :  { %v1070_v54 = vmul.f32 %v1064_v47, %v1030_v45  ;;  %v1040_v56 = vadd.f32 %v2286_v40, %v1039_v53 }
 0x747   :  { %v1077_v58 = vmul.f32 %v1071_v49, %v1035_v42  ;;  %v1067_v59 = vmul.f32 0.044715, %v1045_v50  ;;  %v1061_v37 = vmul.f32 0.5, %v1045_v50 }
 0x748   :  { %v1076_v61 = vmul.f32 %v1070_v54, %v1030_v45  ;;  %v1066_v14 = vmul.f32 0.044715, %v1040_v56  ;;  %v2674_v62 = vpop.f32.mrb[12].mxu0  ;;  %v1060_v41 = vmul.f32 0.5, %v1040_v56 }
 0x749   :  { %v1073_v63 = vmul.f32 %v1067_v59, %v1045_v50  ;;  %v1055_v0 = vadd.f32 %v2674_v62, %v2286_v40  ;;  %v1049_v1 = vpop.f32.mrb[13].mxu0  ;;  %v1083_v3 = vadd.f32 %v1077_v58, %v1035_v42 }
 0x74a   :  { %v1072_v5 = vmul.f32 %v1066_v14, %v1040_v56  ;;  %v1050_v6 = vadd.f32 %v2286_v40, %v1049_v1  ;;  %v1082_v7 = vadd.f32 %v1076_v61, %v1030_v45  ;;  %v2295_v61 = vld [vmem:[%s3957_s7 + $0x100] sm:$0xff]  ;;  %v2296_v14 = vld [vmem:[%s3957_s7 + $0x108] sm:$0xff] }
 0x74b   :  { %v1079_v2 = vmul.f32 %v1073_v63, %v1045_v50  ;;  %v1069_v4 = vmul.f32 0.044715, %v1055_v0  ;;  %v1089_v8 = vmul.f32 0.7978846, %v1083_v3  ;;  %v1063_v48 = vmul.f32 0.5, %v1055_v0  ;;  %v2297_v63 = vld [vmem:[%s3957_s7 + $0x110] sm:$0xff] }
 0x74c   :  { %v1078_v10 = vmul.f32 %v1072_v5, %v1040_v56  ;;  %v1068_v11 = vmul.f32 0.044715, %v1050_v6  ;;  %v1088_v9 = vmul.f32 0.7978846, %v1082_v7  ;;  %v2951_v62 = vpack.c.bf16 %v2296_v14, %v2295_v61  ;;  %v2299_v1 = vld [vmem:[%s3957_s7 + $0x120] sm:$0xff]  ;;  %v2300_v3 = vld [vmem:[%s3957_s7 + $0x128] sm:$0xff] }
 0x74d   :  { %v1075_v13 = vmul.f32 %v1069_v4, %v1055_v0  ;;  %3078 = vtanh.f32 %v1089_v8  ;;  %v1085_v15 = vadd.f32 %v1079_v2, %v1045_v50  ;;  %v1062_v50 = vmul.f32 0.5, %v1050_v6  ;;  %v2302_v7 = vld [vmem:[%s3957_s7 + $0x138] sm:$0xff]  ;;  %v2303_v4 = vld [vmem:[%s3957_s7 + $0x140] sm:$0xff]  ;;  %v2304_v8 = vld [vmem:[%s3957_s7 + $0x148] sm:$0xff] }
 0x74e   :  { %v1074_v12 = vmul.f32 %v1068_v11, %v1050_v6  ;;  %3080 = vtanh.f32 %v1088_v9  ;;  %v1084_v16 = vadd.f32 %v1078_v10, %v1040_v56  ;;  %v2959_v5 = vpack.c.bf16 %v2300_v3, %v2299_v1 }
 0x74f   :  { %v1081_v17 = vmul.f32 %v1075_v13, %v1055_v0  ;;  %v1091_v18 = vmul.f32 0.7978846, %v1085_v15  ;;  %v2967_v10 = vpack.c.bf16 %v2304_v8, %v2303_v4  ;;  %v2305_v13 = vld [vmem:[%s3957_s7 + $0x150] sm:$0xff]  ;;  %v2306_v15 = vld [vmem:[%s3957_s7 + $0x158] sm:$0xff] }
 0x750   :  { %v1080_v19 = vmul.f32 %v1074_v12, %v1050_v6  ;;  %v1090_v20 = vmul.f32 0.7978846, %v1084_v16  ;;  %v2971_v12 = vpack.c.bf16 %v2306_v15, %v2305_v13  ;;  %v2307_v16 = vld [vmem:[%s3957_s7 + $0x160] sm:$0xff] }
 0x751   :  { %3082 = vtanh.f32 %v1091_v18  ;;  %v1087_v21 = vadd.f32 %v1081_v17, %v1055_v0  ;;  %v2298_v0 = vld [vmem:[%s3957_s7 + $0x118] sm:$0xff]  ;;  %v2308_v17 = vld [vmem:[%s3957_s7 + $0x168] sm:$0xff] }
 0x752   :  { %3084 = vtanh.f32 %v1090_v20  ;;  %v1086_v22 = vadd.f32 %v1080_v19, %v1050_v6  ;;  %v2301_v6 = vld [vmem:[%s3957_s7 + $0x130] sm:$0xff]  ;;  %v2975_v18 = vpack.c.bf16 %v2308_v17, %v2307_v16  ;;  %v2310_v20 = vld [vmem:[%s3957_s7 + $0x178] sm:$0xff] }
 0x753   :  { %v1093_v23 = vmul.f32 0.7978846, %v1087_v21  ;;  %v2963_v2 = vpack.c.bf16 %v2302_v7, %v2301_v6  ;;  %v2309_v19 = vld [vmem:[%s3957_s7 + $0x170] sm:$0xff] }
 0x754   :  { %v1092_v24 = vmul.f32 0.7978846, %v1086_v22  ;;  %v2979_v21 = vpack.c.bf16 %v2310_v20, %v2309_v19 }
 0x755   :  { %3086 = vtanh.f32 %v1093_v23 }
 0x756   :  { %3088 = vtanh.f32 %v1092_v24 }
 0x757   :  { %v3079_v25 = vpop.eup %3078 }
 0x758   :  { %v3081_v26 = vpop.eup %3080  ;;  %v1101_v30 = vadd.f32 1.0, %v3079_v25 }
 0x759   :  { %v1100_v32 = vadd.f32 1.0, %v3081_v26 }
 0x75a   :  { %v3612_v33 = vmul.f32 %v1101_v30, %v1059_v27 }
 0x75b   :  { %v3083_v34 = vpop.eup %3082  ;;  %v3614_v35 = vmul.f32 %v1100_v32, %v1058_v31 }
 0x75c   :  { %v3085_v36 = vpop.eup %3084  ;;  %v1103_v38 = vadd.f32 1.0, %v3083_v34 }
 0x75d   :  { %v2939_v40 = vpack.c.bf16 %v3612_v33, %v3614_v35  ;;  %v1102_v44 = vadd.f32 1.0, %v3085_v36 }
 0x75e   :  { %v3618_v46 = vmul.f32 %v1103_v38, %v1061_v37 }
 0x75f   :  { %v3087_v47 = vpop.eup %3086  ;;  %2940 = vmatprep.subr.bf16.mxu0 %v2939_v40  ;;  %v3620_v42 = vmul.f32 %v1102_v44, %v1060_v41 }
 0x760   :  { %v3089_v45 = vpop.eup %3088  ;;  %2942 = vmatpush3.bf16.msra.mxu0 %v2939_v40  ;;  %v1105_v49 = vadd.f32 1.0, %v3087_v47 }
 0x761   :  { %v2943_v53 = vpack.c.bf16 %v3618_v46, %v3620_v42  ;;  %v1104_v54 = vadd.f32 1.0, %v3089_v45 }
 0x762   :  { %v3624_v58 = vmul.f32 %v1105_v49, %v1063_v48 }
 0x763   :  { %2944 = vmatprep.subr.bf16.mxu0 %v2943_v53  ;;  %v3626_v56 = vmul.f32 %v1104_v54, %v1062_v50 }
 0x764   :  { %2946 = vmatpush3.bf16.msra.mxu0 %v2943_v53 }
 0x765   :  { %v2947_v59 = vpack.c.bf16 %v3624_v58, %v3626_v56 }
 0x767   :  { %2948 = vmatprep.subr.bf16.mxu0 %v2947_v59 }
 0x768   :  { %2950 = vmatpush3.bf16.msra.mxu0 %v2947_v59 }
 0x769   :  { %2952 = vmatprep.subr.bf16.mxu0 %v2951_v62 }
 0x76b   :  { %2688 = vmatmul.mubr.msk.f32.vlgmr.msra.gmra.mrb[14].mxu0 %vm232_vm2, %v3310_v43  ;;  %v2955_v43 = vpack.c.bf16 %v2298_v0, %v2297_v63  ;;  %v2312_v63 = vld [vmem:[%s3958_s8 + $0x28] sm:$0xff] }
 0x76c   :  { %2954 = vmatpush3.bf16.msra.mxu0 %v2951_v62  ;;  %v2311_v62 = vld [vmem:[%s3958_s8 + $0x20] sm:$0xff] }
 0x76d   :  { %2956 = vmatprep.subr.bf16.mxu0 %v2955_v43 }
 0x770   :  { %2958 = vmatpush3.bf16.msra.mxu0 %v2955_v43 }
 0x771   :  { %2960 = vmatprep.subr.bf16.mxu0 %v2959_v5 }
 0x774   :  { %2962 = vmatpush3.bf16.msra.mxu0 %v2959_v5 }
 0x775   :  { %2964 = vmatprep.subr.bf16.mxu0 %v2963_v2 }
 0x778   :  { %2966 = vmatpush3.bf16.msra.mxu0 %v2963_v2 }
 0x779   :  { %2968 = vmatprep.subr.bf16.mxu0 %v2967_v10 }
 0x77c   :  { %2970 = vmatpush3.bf16.msra.mxu0 %v2967_v10 }
 0x77d   :  { %2972 = vmatprep.subr.bf16.mxu0 %v2971_v12 }
 0x780   :  { %2974 = vmatpush3.bf16.msra.mxu0 %v2971_v12 }
 0x781   :  { %2976 = vmatprep.subr.bf16.mxu0 %v2975_v18 }
 0x784   :  { %2978 = vmatpush3.bf16.msra.mxu0 %v2975_v18 }
 0x785   :  { %2980 = vmatprep.subr.bf16.mxu0 %v2979_v21 }
 0x788   :  { %2982 = vmatpush3.bf16.msra.mxu0 %v2979_v21 }
 0x83e   :  { %v2689_v11 = vpop.f32.mrb[14].mxu0 }
 0x83f   :  { %1207 = vrot.lane.b32.xlu0 %v2689_v11, %s3149_s24  ;;  %1191 = vrot.lane.b32.xlu1 %v2689_v11, %s3150_s25  ;;  %v1178_v9 = vpop.f32.mrb[15].mxu0 }
 0x843   :  { %1213 = vrot.lane.b32.xlu0 %v2689_v11, %s3151_s30  ;;  %1197 = vrot.lane.b32.xlu1 %v2689_v11, %s3152_s15 }
 0x847   :  { %1219 = vrot.lane.b32.xlu0 %v2689_v11, %s3153_s20  ;;  %1203 = vrot.lane.b32.xlu1 %v2689_v11, %s3154_s5 }
 0x84b   :  { %1209 = vrot.lane.b32.xlu1 %v1178_v9, %s3149_s24  ;;  %1189 = vrot.lane.b32.xlu0 %v1178_v9, %s3150_s25 }
 0x84f   :  { %1215 = vrot.lane.b32.xlu1 %v1178_v9, %s3151_s30  ;;  %1195 = vrot.lane.b32.xlu0 %v1178_v9, %s3152_s15 }
 0x853   :  { %1221 = vrot.lane.b32.xlu1 %v1178_v9, %s3153_s20  ;;  %1201 = vrot.lane.b32.xlu0 %v1178_v9, %s3154_s5 }
 0x857   :  { %1227 = vrot.lane.b32.xlu1 %v1178_v9, %s3155_s1  ;;  %1225 = vrot.lane.b32.xlu0 %v2689_v11, %s3155_s1 }
 0x85b   :  { %1347 = vrot.lane.b32.xlu1 %v3612_v33, %s3150_s25  ;;  %1345 = vrot.lane.b32.xlu0 %v3614_v35, %s3150_s25 }
 0x85f   :  { %1351 = vrot.lane.b32.xlu1 %v3618_v46, %s3150_s25  ;;  %1349 = vrot.lane.b32.xlu0 %v3620_v42, %s3150_s25 }
 0x863   :  { %1355 = vrot.lane.b32.xlu1 %v3624_v58, %s3150_s25  ;;  %1353 = vrot.lane.b32.xlu0 %v3626_v56, %s3150_s25 }
 0x8b1   :  { %v1208_v22 = vpop.permute.xlu0 %1207  ;;  %v1192_v23 = vpop.permute.xlu1 %1191 }
 0x8b2   :  { %v1232_v34 = vsel %vm358_vm3, %v2689_v11, %v1192_v23 }
 0x8b5   :  { %v1214_v24 = vpop.permute.xlu0 %1213  ;;  %v1198_v25 = vpop.permute.xlu1 %1197 }
 0x8b6   :  { %v1234_v36 = vsel %vm361_vm4, %v1232_v34, %v1198_v25 }
 0x8b9   :  { %v1220_v26 = vpop.permute.xlu0 %1219  ;;  %v1204_v27 = vpop.permute.xlu1 %1203 }
 0x8ba   :  { %v1236_v41 = vsel %vm232_vm2, %v1234_v36, %v1204_v27 }
 0x8bd   :  { %v1210_v30 = vpop.permute.xlu1 %1209  ;;  %v1190_v31 = vpop.permute.xlu0 %1189 }
 0x8be   :  { %v1231_v35 = vsel %vm358_vm3, %v1178_v9, %v1190_v31  ;;  %v1238_v46 = vsel %vm366_vm5, %v1236_v41, %v1210_v30 }
 0x8c1   :  { %v1216_v32 = vpop.permute.xlu1 %1215  ;;  %v1196_v33 = vpop.permute.xlu0 %1195 }
 0x8c2   :  { %v1233_v37 = vsel %vm361_vm4, %v1231_v35, %v1196_v33  ;;  %v1240_v42 = vsel %vm369_vm6, %v1238_v46, %v1216_v32 }
 0x8c5   :  { %v1222_v38 = vpop.permute.xlu1 %1221  ;;  %v1202_v40 = vpop.permute.xlu0 %1201 }
 0x8c6   :  { %v1235_v44 = vsel %vm232_vm2, %v1233_v37, %v1202_v40  ;;  %v1242_v48 = vsel %vm372_vm7, %v1240_v42, %v1222_v38 }
 0x8c7   :  { %v1237_v47 = vsel %vm366_vm5, %v1235_v44, %v1208_v22 }
 0x8c8   :  { %v1239_v45 = vsel %vm369_vm6, %v1237_v47, %v1214_v24 }
 0x8c9   :  { %v1228_v49 = vpop.permute.xlu1 %1227  ;;  %v1241_v53 = vsel %vm372_vm7, %v1239_v45, %v1220_v26  ;;  %v1226_v50 = vpop.permute.xlu0 %1225 }
 0x8ca   :  { %v1244_v54 = vsel %vm375_vm8, %v1242_v48, %v1228_v49  ;;  %v1243_v58 = vsel %vm375_vm8, %v1241_v53, %v1226_v50 }
 0x8cb   :  { %v1246_v56 = vmul.f32 %v1244_v54, %v3400_v28  ;;  %v1245_v59 = vmul.f32 %v1243_v58, %v3405_v29  ;;  %v2987_v29 = vpack.c.bf16 %v2312_v63, %v2311_v62 }
 0x8cd   :  { %2722 = vmatprep.mubr.f32.mxu0 %v1245_v59  ;;  %v1346_v61 = vpop.permute.xlu0 %1345  ;;  %v1348_v1 = vpop.permute.xlu1 %1347 }
 0x8ce   :  { %v1363_v14 = vsel %vm358_vm3, %v3417_v39, %v1346_v61  ;;  %2723 = vmatmul.mubr.f32.vlgmr.msra.gmra.mrb[16].mxu0 %v1246_v56  ;;  %v1364_v5 = vsel %vm358_vm3, %v3431_v51, %v1348_v1 }
 0x8cf   :  { %2733 = vmatprep.mubr.msk.f32.mxu1 %vm361_vm4, %v1363_v14 }
 0x8d1   :  { %v1350_v39 = vpop.permute.xlu0 %1349  ;;  %v1352_v3 = vpop.permute.xlu1 %1351 }
 0x8d2   :  { %v1365_v6 = vsel %vm358_vm3, %v3436_v52, %v1350_v39  ;;  %v1366_v2 = vsel %vm358_vm3, %v3443_v55, %v1352_v3  ;;  %v3114_v52 = vld [vmem:[%s3952_s2] sm:$0xff] }
 0x8d3   :  { %v2314_v55 = vld [vmem:[%s3959_s9 + $0x2] ss:$0 sm:$0xff] }
 0x8d5   :  { %v1354_v7 = vpop.permute.xlu0 %1353  ;;  %v1356_v4 = vpop.permute.xlu1 %1355 }
 0x8d6   :  { %v1367_v8 = vsel %vm358_vm3, %v3451_v57, %v1354_v7  ;;  %v1368_v51 = vsel %vm358_vm3, %v3459_v60, %v1356_v4 }
 0x9a1   :  { %v2724_v0 = vpop.f32.mrb[16].mxu0 }
 0x9a2   :  { %v1330_v28 = vpop.f32.mrb[17].mxu0 }
 0x9a3   :  { %v2983_v43 = vpack.c.bf16 %v2724_v0, %v1330_v28 }
 0x9a5   :  { %2984 = vmatprep.subr.bf16.mxu1 %v2983_v43 }
 0x9a6   :  { %2986 = vmatpush3.bf16.msra.mxu1 %v2983_v43 }
 0x9a7   :  { %2988 = vmatprep.subr.bf16.mxu1 %v2987_v29 }
 0x9aa   :  { %2990 = vmatpush3.bf16.msra.mxu1 %v2987_v29 }
 0x9ad   :  { %2734 = vmatmul.mubr.msk.f32.vlgmr.msra.gmra.mrb[12].mxu1 %vm361_vm4, %v1364_v5 }
 0x9ae   :  { %2736 = vmatprep.mubr.msk.f32.mxu1 %vm361_vm4, %v1365_v6 }
 0x9b1   :  { %2737 = vmatmul.mubr.msk.f32.gmra.mrb[14].mxu1 %vm361_vm4, %v1366_v2 }
 0x9b2   :  { %2739 = vmatprep.mubr.msk.f32.mxu1 %vm361_vm4, %v1367_v8 }
 0x9b5   :  { %2740 = vmatmul.mubr.msk.f32.gmra.mrb[16].mxu1 %vm361_vm4, %v1368_v51 }
 0x9b6   :  { %2754 = vmatprep.mubr.msk.f32.mxu1 %vm232_vm2, %v3114_v52 }
 0xa80   :  { %v2735_v57 = vpop.f32.mrb[12].mxu1 }
 0xa81   :  { %v1470_v10 = vadd.f32 %v2735_v57, %v2314_v55  ;;  %v1464_v11 = vpop.f32.mrb[13].mxu1 }
 0xa82   :  { %v1465_v9 = vadd.f32 %v2314_v55, %v1464_v11 }
 0xa83   :  { %v1500_v13 = vmul.f32 0.044715, %v1470_v10  ;;  %v1494_v61 = vmul.f32 0.5, %v1470_v10 }
 0xa84   :  { %v1499_v15 = vmul.f32 0.044715, %v1465_v9  ;;  %v2738_v12 = vpop.f32.mrb[14].mxu1  ;;  %v1493_v62 = vmul.f32 0.5, %v1465_v9 }
 0xa85   :  { %v1506_v60 = vmul.f32 %v1500_v13, %v1470_v10  ;;  %v1480_v16 = vadd.f32 %v2738_v12, %v2314_v55  ;;  %v1474_v17 = vpop.f32.mrb[15].mxu1  ;;  %v2323_v12 = vld [vmem:[%s3957_s7 + $0x180] sm:$0xff] }
 0xa86   :  { %v1505_v18 = vmul.f32 %v1499_v15, %v1465_v9  ;;  %v1475_v19 = vadd.f32 %v2314_v55, %v1474_v17  ;;  %v3115_v15 = vld [vmem:[%s3952_s2 + $0x8] sm:$0xff]  ;;  %v2325_v17 = vld [vmem:[%s3957_s7 + $0x190] sm:$0xff] }
 0xa87   :  { %v1512_v20 = vmul.f32 %v1506_v60, %v1470_v10  ;;  %v1502_v21 = vmul.f32 0.044715, %v1480_v16  ;;  %v1496_v1 = vmul.f32 0.5, %v1480_v16  ;;  %v2324_v60 = vld [vmem:[%s3957_s7 + $0x188] sm:$0xff] }
 0xa88   :  { %v1511_v22 = vmul.f32 %v1505_v18, %v1465_v9  ;;  %v1501_v23 = vmul.f32 0.044715, %v1475_v19  ;;  %v2741_v24 = vpop.f32.mrb[16].mxu1  ;;  %v1495_v5 = vmul.f32 0.5, %v1475_v19  ;;  %v2326_v18 = vld [vmem:[%s3957_s7 + $0x198] sm:$0xff] }
 0xa89   :  { %v1508_v25 = vmul.f32 %v1502_v21, %v1480_v16  ;;  %v1490_v26 = vadd.f32 %v2741_v24, %v2314_v55  ;;  %v1484_v27 = vpop.f32.mrb[17].mxu1  ;;  %v1518_v30 = vadd.f32 %v1512_v20, %v1470_v10  ;;  %v2327_v20 = vld [vmem:[%s3957_s7 + $0x1a0] sm:$0xff]  ;;  %v2328_v21 = vld [vmem:[%s3957_s7 + $0x1a8] sm:$0xff]  ;;  %v2330_v24 = vld [vmem:[%s3957_s7 + $0x1b8] sm:$0xff] }
 0xa8a   :  { %v1507_v31 = vmul.f32 %v1501_v23, %v1475_v19  ;;  %v1485_v32 = vadd.f32 %v2314_v55, %v1484_v27  ;;  %v1517_v33 = vadd.f32 %v1511_v22, %v1465_v9  ;;  %v3011_v22 = vpack.c.bf16 %v2328_v21, %v2327_v20  ;;  %v2329_v23 = vld [vmem:[%s3957_s7 + $0x1b0] sm:$0xff]  ;;  %v2332_v27 = vld [vmem:[%s3957_s7 + $0x1c8] sm:$0xff] }
 0xa8b   :  { %v1514_v34 = vmul.f32 %v1508_v25, %v1480_v16  ;;  %v1504_v35 = vmul.f32 0.044715, %v1490_v26  ;;  %v1524_v36 = vmul.f32 0.7978846, %v1518_v30  ;;  %v1498_v51 = vmul.f32 0.5, %v1490_v26 }
 0xa8c   :  { %v1513_v37 = vmul.f32 %v1507_v31, %v1475_v19  ;;  %v1503_v38 = vmul.f32 0.044715, %v1485_v32  ;;  %v1523_v40 = vmul.f32 0.7978846, %v1517_v33  ;;  %v1497_v57 = vmul.f32 0.5, %v1485_v32  ;;  %v2333_v33 = vld [vmem:[%s3957_s7 + $0x1d0] sm:$0xff] }
 0xa8d   :  { %v1510_v41 = vmul.f32 %v1504_v35, %v1490_v26  ;;  %3090 = vtanh.f32 %v1524_v36  ;;  %v1520_v44 = vadd.f32 %v1514_v34, %v1480_v16  ;;  %v3003_v16 = vpack.c.bf16 %v2324_v60, %v2323_v12  ;;  %v2334_v34 = vld [vmem:[%s3957_s7 + $0x1d8] sm:$0xff]  ;;  %v2335_v36 = vld [vmem:[%s3957_s7 + $0x1e0] sm:$0xff]  ;;  %v2339_v12 = vld [vmem:[%s3958_s8 + $0x30] sm:$0xff] }
 0xa8e   :  { %v1509_v46 = vmul.f32 %v1503_v38, %v1485_v32  ;;  %3092 = vtanh.f32 %v1523_v40  ;;  %v1519_v47 = vadd.f32 %v1513_v37, %v1475_v19  ;;  %v3007_v19 = vpack.c.bf16 %v2326_v18, %v2325_v17  ;;  %v2336_v37 = vld [vmem:[%s3957_s7 + $0x1e8] sm:$0xff]  ;;  %v2337_v40 = vld [vmem:[%s3957_s7 + $0x1f0] sm:$0xff]  ;;  %v2340_v60 = vld [vmem:[%s3958_s8 + $0x38] sm:$0xff] }
 0xa8f   :  { %v1516_v42 = vmul.f32 %v1510_v41, %v1490_v26  ;;  %v1526_v45 = vmul.f32 0.7978846, %v1520_v44  ;;  %v3015_v25 = vpack.c.bf16 %v2330_v24, %v2329_v23  ;;  %v3023_v35 = vpack.c.bf16 %v2334_v34, %v2333_v33  ;;  %v2338_v41 = vld [vmem:[%s3957_s7 + $0x1f8] sm:$0xff]  ;;  %v3119_v23 = vld [vmem:[%s3953_s3 + $0x8] sm:$0xff]  ;;  %v3122_v33 = vld [vmem:[%s3953_s3 + $0x20] sm:$0xff] }
 0xa90   :  { %v1515_v48 = vmul.f32 %v1509_v46, %v1485_v32  ;;  %v1525_v49 = vmul.f32 0.7978846, %v1519_v47  ;;  %v3027_v38 = vpack.c.bf16 %v2336_v37, %v2335_v36  ;;  %v3031_v44 = vpack.c.bf16 %v2338_v41, %v2337_v40  ;;  %v2342_v37 = vld [vmem:[%s3959_s9 + $0x3] ss:$0 sm:$0xff] }
 0xa91   :  { %3094 = vtanh.f32 %v1526_v45  ;;  %v1522_v53 = vadd.f32 %v1516_v42, %v1490_v26  ;;  %v2331_v26 = vld [vmem:[%s3957_s7 + $0x1c0] sm:$0xff] }
 0xa92   :  { %3096 = vtanh.f32 %v1525_v49  ;;  %v1521_v50 = vadd.f32 %v1515_v48, %v1485_v32  ;;  %v3019_v30 = vpack.c.bf16 %v2332_v27, %v2331_v26 }
 0xa93   :  { %v1528_v54 = vmul.f32 0.7978846, %v1522_v53 }
 0xa94   :  { %v1527_v58 = vmul.f32 0.7978846, %v1521_v50 }
 0xa95   :  { %3098 = vtanh.f32 %v1528_v54 }
 0xa96   :  { %3100 = vtanh.f32 %v1527_v58 }
 0xa97   :  { %v3091_v56 = vpop.eup %3090 }
 0xa98   :  { %v3093_v59 = vpop.eup %3092  ;;  %v1536_v14 = vadd.f32 1.0, %v3091_v56 }
 0xa99   :  { %v1535_v63 = vadd.f32 1.0, %v3093_v59 }
 0xa9a   :  { %v3753_v0 = vmul.f32 %v1536_v14, %v1494_v61 }
 0xa9b   :  { %v3095_v28 = vpop.eup %3094  ;;  %v3755_v43 = vmul.f32 %v1535_v63, %v1493_v62 }
 0xa9c   :  { %v3097_v29 = vpop.eup %3096  ;;  %v1538_v39 = vadd.f32 1.0, %v3095_v28 }
 0xa9d   :  { %v2991_v3 = vpack.c.bf16 %v3753_v0, %v3755_v43  ;;  %v1537_v6 = vadd.f32 1.0, %v3097_v29 }
 0xa9e   :  { %v3759_v7 = vmul.f32 %v1538_v39, %v1496_v1 }
 0xa9f   :  { %v3099_v2 = vpop.eup %3098  ;;  %2992 = vmatprep.subr.bf16.mxu1 %v2991_v3  ;;  %v3761_v4 = vmul.f32 %v1537_v6, %v1495_v5 }
 0xaa0   :  { %v3101_v8 = vpop.eup %3100  ;;  %2994 = vmatpush3.bf16.msra.mxu1 %v2991_v3  ;;  %v1540_v52 = vadd.f32 1.0, %v3099_v2 }
 0xaa1   :  { %v2995_v55 = vpack.c.bf16 %v3759_v7, %v3761_v4  ;;  %v1539_v10 = vadd.f32 1.0, %v3101_v8  ;;  %v3116_v8 = vld [vmem:[%s3954_s4 + $0x8] sm:$0xff] }
 0xaa2   :  { %v3765_v11 = vmul.f32 %v1540_v52, %v1498_v51  ;;  %v3117_v52 = vld [vmem:[%s3954_s4] sm:$0xff] }
 0xaa3   :  { %2996 = vmatprep.subr.bf16.mxu1 %v2995_v55  ;;  %v3767_v9 = vmul.f32 %v1539_v10, %v1497_v57  ;;  %v3118_v10 = vld [vmem:[%s3953_s3] sm:$0xff] }
 0xaa4   :  { %2998 = vmatpush3.bf16.msra.mxu1 %v2995_v55 }
 0xaa5   :  { %v2999_v13 = vpack.c.bf16 %v3765_v11, %v3767_v9 }
 0xaa7   :  { %3000 = vmatprep.subr.bf16.mxu1 %v2999_v13 }
 0xaa8   :  { %3002 = vmatpush3.bf16.msra.mxu1 %v2999_v13  ;;  %v1929_v13 = vld [vmem:[%s3960_s10 + $0x8] sm:$0xff] }
 0xaa9   :  { %3004 = vmatprep.subr.bf16.mxu1 %v3003_v16 }
 0xaab   :  { %2755 = vmatmul.mubr.msk.f32.vlgmr.msra.gmra.mrb[18].mxu1 %vm232_vm2, %v3115_v15 }
 0xaac   :  { %3006 = vmatpush3.bf16.msra.mxu1 %v3003_v16 }
 0xaad   :  { %3008 = vmatprep.subr.bf16.mxu1 %v3007_v19 }
 0xab0   :  { %3010 = vmatpush3.bf16.msra.mxu1 %v3007_v19  ;;  %v3039_v19 = vpack.c.bf16 %v2340_v60, %v2339_v12 }
 0xab1   :  { %3012 = vmatprep.subr.bf16.mxu1 %v3011_v22 }
 0xab4   :  { %3014 = vmatpush3.bf16.msra.mxu1 %v3011_v22 }
 0xab5   :  { %3016 = vmatprep.subr.bf16.mxu1 %v3015_v25 }
 0xab8   :  { %3018 = vmatpush3.bf16.msra.mxu1 %v3015_v25  ;;  %v3120_v25 = vld [vmem:[%s3953_s3 + $0x10] sm:$0xff] }
 0xab9   :  { %3020 = vmatprep.subr.bf16.mxu1 %v3019_v30 }
 0xabc   :  { %3022 = vmatpush3.bf16.msra.mxu1 %v3019_v30  ;;  %v3121_v30 = vld [vmem:[%s3953_s3 + $0x18] sm:$0xff] }
 0xabd   :  { %3024 = vmatprep.subr.bf16.mxu1 %v3023_v35 }
 0xac0   :  { %3026 = vmatpush3.bf16.msra.mxu1 %v3023_v35  ;;  %v3123_v35 = vld [vmem:[%s3953_s3 + $0x28] sm:$0xff] }
 0xac1   :  { %3028 = vmatprep.subr.bf16.mxu1 %v3027_v38 }
 0xac4   :  { %3030 = vmatpush3.bf16.msra.mxu1 %v3027_v38 }
 0xac5   :  { %3032 = vmatprep.subr.bf16.mxu1 %v3031_v44 }
 0xac8   :  { %3034 = vmatpush3.bf16.msra.mxu1 %v3031_v44 }
 0xb7e   :  { %v2756_v31 = vpop.f32.mrb[18].mxu1 }
 0xb7f   :  { %1642 = vrot.lane.b32.xlu0 %v2756_v31, %s3149_s24  ;;  %1626 = vrot.lane.b32.xlu1 %v2756_v31, %s3150_s25  ;;  %v1613_v32 = vpop.f32.mrb[19].mxu1 }
 0xb83   :  { %1648 = vrot.lane.b32.xlu0 %v2756_v31, %s3151_s30  ;;  %1632 = vrot.lane.b32.xlu1 %v2756_v31, %s3152_s15 }
 0xb87   :  { %1654 = vrot.lane.b32.xlu0 %v2756_v31, %s3153_s20  ;;  %1638 = vrot.lane.b32.xlu1 %v2756_v31, %s3154_s5 }
 0xb8b   :  { %1644 = vrot.lane.b32.xlu1 %v1613_v32, %s3149_s24  ;;  %1624 = vrot.lane.b32.xlu0 %v1613_v32, %s3150_s25 }
 0xb8f   :  { %1650 = vrot.lane.b32.xlu1 %v1613_v32, %s3151_s30  ;;  %1630 = vrot.lane.b32.xlu0 %v1613_v32, %s3152_s15 }
 0xb93   :  { %1656 = vrot.lane.b32.xlu1 %v1613_v32, %s3153_s20  ;;  %1636 = vrot.lane.b32.xlu0 %v1613_v32, %s3154_s5  ;;  %s3156_s20 = smov [#allocation2]  }
 0xb94   :  { %s2237_s5 = sshll.u32 %s3156_s20, 4  ;;  %s2238_s5 = int_to_ptr.vmem [resolvable:$true] %s2237_s5 }
 0xb95   :  { %p3129_p1 = scmp.lt.s32.totalorder %s2238_s5, %s2238_s5 }
 0xb97   :  { %1662 = vrot.lane.b32.xlu1 %v1613_v32, %s3155_s1  ;;  %1660 = vrot.lane.b32.xlu0 %v2756_v31, %s3155_s1 }
 0xb9b   :  { %1782 = vrot.lane.b32.xlu1 %v3753_v0, %s3150_s25  ;;  %1780 = vrot.lane.b32.xlu0 %v3755_v43, %s3150_s25 }
 0xb9f   :  { %1786 = vrot.lane.b32.xlu1 %v3759_v7, %s3150_s25  ;;  %1784 = vrot.lane.b32.xlu0 %v3761_v4, %s3150_s25 }
 0xba3   :  { %1790 = vrot.lane.b32.xlu1 %v3765_v11, %s3150_s25  ;;  %1788 = vrot.lane.b32.xlu0 %v3767_v9, %s3150_s25  ;;  %v1928_v9 = vld [vmem:[%s3960_s10] sm:$0xff] }
 0xba4   :  { %v3043_v15 = vpack.c.bf16 %v1929_v13, %v1928_v9 }
 0xba6   :  { %3051 = vmatprep.subr.bf16.mxu1 %v3043_v15 }
 0xbf1   :  { %v1643_v46 = vpop.permute.xlu0 %1642  ;;  %v1627_v47 = vpop.permute.xlu1 %1626 }
 0xbf2   :  { %v1667_v56 = vsel %vm358_vm3, %v2756_v31, %v1627_v47 }
 0xbf5   :  { %v1649_v42 = vpop.permute.xlu0 %1648  ;;  %v1633_v45 = vpop.permute.xlu1 %1632 }
 0xbf6   :  { %v1669_v61 = vsel %vm361_vm4, %v1667_v56, %v1633_v45 }
 0xbf9   :  { %v1655_v48 = vpop.permute.xlu0 %1654  ;;  %v1639_v49 = vpop.permute.xlu1 %1638 }
 0xbfa   :  { %v1671_v0 = vsel %vm232_vm2, %v1669_v61, %v1639_v49 }
 0xbfd   :  { %v1645_v53 = vpop.permute.xlu1 %1644  ;;  %v1625_v50 = vpop.permute.xlu0 %1624 }
 0xbfe   :  { %v1666_v59 = vsel %vm358_vm3, %v1613_v32, %v1625_v50  ;;  %v1673_v43 = vsel %vm366_vm5, %v1671_v0, %v1645_v53 }
 0xc01   :  { %v1651_v54 = vpop.permute.xlu1 %1650  ;;  %v1631_v58 = vpop.permute.xlu0 %1630 }
 0xc02   :  { %v1668_v14 = vsel %vm361_vm4, %v1666_v59, %v1631_v58  ;;  %v1675_v1 = vsel %vm369_vm6, %v1673_v43, %v1651_v54  ;;  %v2104_v54 = vld [vmem:[%s3962_s12] sm:$0xff]  ;;  %v2105_v58 = vld [vmem:[%s3962_s12 + $0x8] sm:$0xff] }
 0xc03   :  { %v3047_v56 = vpack.c.bf16 %v2105_v58, %v2104_v54  ;;  %v2349_v59 = vld [vmem:[%s3961_s11] ss:$0 sm:$0xff] }
 0xc05   :  { %v1657_v62 = vpop.permute.xlu1 %1656  ;;  %v1637_v63 = vpop.permute.xlu0 %1636 }
 0xc06   :  { %v1670_v28 = vsel %vm232_vm2, %v1668_v14, %v1637_v63  ;;  %v1677_v3 = vsel %vm372_vm7, %v1675_v1, %v1657_v62 }
 0xc07   :  { %v1672_v29 = vsel %vm366_vm5, %v1670_v28, %v1643_v46 }
 0xc08   :  { %v1674_v39 = vsel %vm369_vm6, %v1672_v29, %v1649_v42 }
 0xc09   :  { %v1663_v5 = vpop.permute.xlu1 %1662  ;;  %v1676_v6 = vsel %vm372_vm7, %v1674_v39, %v1655_v48  ;;  %v1661_v7 = vpop.permute.xlu0 %1660 }
 0xc0a   :  { %v1679_v2 = vsel %vm375_vm8, %v1677_v3, %v1663_v5  ;;  %v1678_v4 = vsel %vm375_vm8, %v1676_v6, %v1661_v7 }
 0xc0b   :  { %v1681_v51 = vmul.f32 %v3116_v8, %v1679_v2  ;;  %v1680_v55 = vmul.f32 %v3117_v52, %v1678_v4 }
 0xc0d   :  { %2789 = vmatprep.mubr.f32.mxu1 %v1680_v55  ;;  %v1781_v57 = vpop.permute.xlu0 %1780  ;;  %v1783_v20 = vpop.permute.xlu1 %1782 }
 0xc0e   :  { %v1798_v11 = vsel %vm358_vm3, %v3118_v10, %v1781_v57  ;;  %2790 = vmatmul.mubr.f32.vlgmr.msra.gmra.mrb[20].mxu1 %v1681_v51  ;;  %v1799_v24 = vsel %vm358_vm3, %v3119_v23, %v1783_v20 }
 0xc0f   :  { %2800 = vmatprep.mubr.msk.f32.mxu0 %vm361_vm4, %v1798_v11  ;;  %3052 = vmatpush3.bf16.msra.mxu1 %v3043_v15 }
 0xc11   :  { %v1785_v21 = vpop.permute.xlu0 %1784  ;;  %v1787_v22 = vpop.permute.xlu1 %1786 }
 0xc12   :  { %v1800_v26 = vsel %vm358_vm3, %v3120_v25, %v1785_v21  ;;  %v1801_v31 = vsel %vm358_vm3, %v3121_v30, %v1787_v22 }
 0xc15   :  { %v1789_v27 = vpop.permute.xlu0 %1788  ;;  %v1791_v32 = vpop.permute.xlu1 %1790 }
 0xc16   :  { %v1802_v34 = vsel %vm358_vm3, %v3122_v33, %v1789_v27  ;;  %v1803_v36 = vsel %vm358_vm3, %v3123_v35, %v1791_v32 }
 0xce1   :  { %v2791_v16 = vpop.f32.mrb[20].mxu1 }
 0xce2   :  { %v1765_v17 = vpop.f32.mrb[21].mxu1 }
 0xce3   :  { %v3035_v18 = vpack.c.bf16 %v2791_v16, %v1765_v17 }
 0xce5   :  { %3036 = vmatprep.subr.bf16.mxu0 %v3035_v18 }
 0xce6   :  { %3038 = vmatpush3.bf16.msra.mxu0 %v3035_v18 }
 0xce7   :  { %3040 = vmatprep.subr.bf16.mxu0 %v3039_v19 }
 0xcea   :  { %3042 = vmatpush3.bf16.msra.mxu0 %v3039_v19 }
 0xceb   :  { %3044 = vmatprep.subr.bf16.mxu0 %v3043_v15 }
 0xced   :  { %2801 = vmatmul.mubr.msk.f32.vlgmr.msra.gmra.mrb[18].mxu0 %vm361_vm4, %v1799_v24 }
 0xcee   :  { %2803 = vmatprep.mubr.msk.f32.mxu0 %vm361_vm4, %v1800_v26  ;;  %3046 = vmatpush3.bf16.msra.mxu0 %v3043_v15 }
 0xcef   :  { %3048 = vmatprep.subr.bf16.mxu0 %v3047_v56 }
 0xcf1   :  { %2804 = vmatmul.mubr.msk.f32.gmra.mrb[20].mxu0 %vm361_vm4, %v1801_v31 }
 0xcf2   :  { %2806 = vmatprep.mubr.msk.f32.mxu0 %vm361_vm4, %v1802_v34 }
 0xcf5   :  { %2807 = vmatmul.mubr.msk.f32.gmra.mrb[22].mxu0 %vm361_vm4, %v1803_v36 }
 0xdc0   :  { %v2802_v38 = vpop.f32.mrb[18].mxu0 }
 0xdc1   :  { %v1899_v40 = vpop.f32.mrb[19].mxu0  ;;  %v1905_v44 = vadd.f32 %v2802_v38, %v2342_v37 }
 0xdc2   :  { %v1900_v41 = vadd.f32 %v2342_v37, %v1899_v40 }
 0xdc4   :  { %v2805_v46 = vpop.f32.mrb[20].mxu0  ;;  %2813 = vmatprep.mubr.msk.f32.mxu0 %vm358_vm3, %v1900_v41 }
 0xdc5   :  { %v1909_v47 = vpop.f32.mrb[21].mxu0  ;;  %2814 = vmatmul.mubr.msk.f32.vlgmr.msra.gmra.mrb[24].mxu0 %vm358_vm3, %v1905_v44  ;;  %v1915_v45 = vadd.f32 %v2805_v46, %v2342_v37 }
 0xdc6   :  { %v1910_v42 = vadd.f32 %v2342_v37, %v1909_v47  ;;  %3050 = vmatpush3.bf16.msra.mxu0 %v3047_v56 }
 0xdc8   :  { %v2808_v48 = vpop.f32.mrb[22].mxu0  ;;  %2816 = vmatprep.mubr.msk.f32.mxu0 %vm358_vm3, %v1910_v42 }
 0xdc9   :  { %v1919_v49 = vpop.f32.mrb[23].mxu0  ;;  %2817 = vmatmul.mubr.msk.f32.gmra.mrb[26].mxu0 %vm358_vm3, %v1915_v45  ;;  %v1925_v50 = vadd.f32 %v2808_v48, %v2342_v37 }
 0xdca   :  { %v1920_v53 = vadd.f32 %v2342_v37, %v1919_v49 }
 0xdcc   :  { %2819 = vmatprep.mubr.msk.f32.mxu1 %vm358_vm3, %v1920_v53 }
 0xdcd   :  { %2820 = vmatmul.mubr.msk.f32.vlgmr.msra.gmra.mrb[22].mxu1 %vm358_vm3, %v1925_v50 }
 0xe98   :  { %v2815_v61 = vpop.f32.mrb[24].mxu0 }
 0xe99   :  { %v2027_v14 = vadd.f32 %v2815_v61, %v2349_v59  ;;  %v2021_v62 = vpop.f32.mrb[25].mxu0 }
 0xe9a   :  { %v2022_v63 = vadd.f32 %v2349_v59, %v2021_v62  ;;  %v2356_v62 = vld [vmem:[%s3963_s13] ss:$0 sm:$0xff]  ;;  %s3124_s13 = scalar_lea.vmem %s2238_s5, 768 }
 0xe9b   :  { %v2057_v0 = vmul.f32 0.044715, %v2027_v14  ;;  %v2051_v37 = vmul.f32 0.5, %v2027_v14  ;;  %p3125_p0 = scmp.ne.s32.totalorder %s2238_s5, %s3124_s13  ;;  %p3130_p2 = scmp.lt.s32.totalorder %s3124_s13, %s3124_s13 }
 0xe9c   :  { %v2056_v28 = vmul.f32 0.044715, %v2022_v63  ;;  %v2818_v43 = vpop.f32.mrb[26].mxu0  ;;  %v2050_v35 = vmul.f32 0.5, %v2022_v63 }
 0xe9d   :  { %v2063_v29 = vmul.f32 %v2057_v0, %v2027_v14  ;;  %v2037_v1 = vadd.f32 %v2818_v43, %v2349_v59  ;;  %v2031_v39 = vpop.f32.mrb[27].mxu0  ;;  %p3131_p3 = por %p3130_p2, %p3129_p1 }
 0xe9e   :  { %v2062_v3 = vmul.f32 %v2056_v28, %v2022_v63  ;;  %v2032_v5 = vadd.f32 %v2349_v59, %v2031_v39 }
 0xe9f   :  { %v2069_v6 = vmul.f32 %v2063_v29, %v2027_v14  ;;  %v2059_v7 = vmul.f32 0.044715, %v2037_v1  ;;  %v2053_v45 = vmul.f32 0.5, %v2037_v1  ;;  %p3132_p4 = pnand %p3131_p3, %p3125_p0 }
 0xea0   :  { %v2068_v2 = vmul.f32 %v2062_v3, %v2022_v63  ;;  %v2058_v4 = vmul.f32 0.044715, %v2032_v5  ;;  %v2821_v8 = vpop.f32.mrb[22].mxu1  ;;  %v2052_v47 = vmul.f32 0.5, %v2032_v5 }
 0xea1   :  { %v2075_v51 = vadd.f32 %v2069_v6, %v2027_v14  ;;  %v2065_v52 = vmul.f32 %v2059_v7, %v2037_v1  ;;  %v2047_v55 = vadd.f32 %v2821_v8, %v2349_v59  ;;  %v2041_v57 = vpop.f32.mrb[23].mxu1 }
 0xea2   :  { %v2074_v10 = vadd.f32 %v2068_v2, %v2022_v63  ;;  %v2064_v11 = vmul.f32 %v2058_v4, %v2032_v5  ;;  %v2042_v9 = vadd.f32 %v2349_v59, %v2041_v57 }
 0xea3   :  { %v2081_v13 = vmul.f32 0.7978846, %v2075_v51  ;;  %v2071_v15 = vmul.f32 %v2065_v52, %v2037_v1  ;;  %v2061_v12 = vmul.f32 0.044715, %v2047_v55  ;;  %v2055_v59 = vmul.f32 0.5, %v2047_v55 }
 0xea4   :  { %v2070_v60 = vmul.f32 %v2064_v11, %v2032_v5  ;;  %v2060_v16 = vmul.f32 0.044715, %v2042_v9  ;;  %v2080_v17 = vmul.f32 0.7978846, %v2074_v10  ;;  %v2054_v58 = vmul.f32 0.5, %v2042_v9 }
 0xea5   :  { %3102 = vtanh.f32 %v2081_v13  ;;  %v2077_v18 = vadd.f32 %v2071_v15, %v2037_v1  ;;  %v2067_v19 = vmul.f32 %v2061_v12, %v2047_v55 }
 0xea6   :  { %v2076_v20 = vadd.f32 %v2070_v60, %v2032_v5  ;;  %v2066_v21 = vmul.f32 %v2060_v16, %v2042_v9  ;;  %3104 = vtanh.f32 %v2080_v17 }
 0xea7   :  { %v2073_v22 = vmul.f32 %v2067_v19, %v2047_v55  ;;  %v2083_v23 = vmul.f32 0.7978846, %v2077_v18 }
 0xea8   :  { %v2072_v24 = vmul.f32 %v2066_v21, %v2042_v9  ;;  %v2082_v25 = vmul.f32 0.7978846, %v2076_v20 }
 0xea9   :  { %v2079_v26 = vadd.f32 %v2073_v22, %v2047_v55  ;;  %3106 = vtanh.f32 %v2083_v23 }
 0xeaa   :  { %v2078_v27 = vadd.f32 %v2072_v24, %v2042_v9  ;;  %3108 = vtanh.f32 %v2082_v25 }
 0xeab   :  { %v2085_v30 = vmul.f32 0.7978846, %v2079_v26 }
 0xeac   :  { %v2084_v31 = vmul.f32 0.7978846, %v2078_v27 }
 0xead   :  { %3110 = vtanh.f32 %v2085_v30 }
 0xeae   :  { %3112 = vtanh.f32 %v2084_v31 }
 0xeaf   :  { %v3103_v32 = vpop.eup %3102 }
 0xeb0   :  { %v3105_v33 = vpop.eup %3104  ;;  %v2093_v34 = vadd.f32 1.0, %v3103_v32 }
 0xeb1   :  { %v2092_v36 = vadd.f32 1.0, %v3105_v33 }
 0xeb2   :  { %v2099_v44 = vmul.f32 %v2093_v34, %v2051_v37 }
 0xeb3   :  { %v3107_v38 = vpop.eup %3106  ;;  %v2098_v40 = vmul.f32 %v2092_v36, %v2050_v35 }
 0xeb4   :  { %v3109_v41 = vpop.eup %3108  ;;  %v2095_v46 = vadd.f32 1.0, %v3107_v38 }
 0xeb5   :  { %2826 = vmatprep.mubr.msk.f32.mxu0 %vm358_vm3, %v2098_v40  ;;  %v2094_v42 = vadd.f32 1.0, %v3109_v41 }
 0xeb6   :  { %2827 = vmatmul.mubr.msk.f32.vlgmr.msra.gmra.mrb[28].mxu0 %vm358_vm3, %v2099_v44  ;;  %v2101_v50 = vmul.f32 %v2095_v46, %v2053_v45 }
 0xeb7   :  { %v3111_v48 = vpop.eup %3110  ;;  %v2100_v49 = vmul.f32 %v2094_v42, %v2052_v47 }
 0xeb8   :  { %v3113_v53 = vpop.eup %3112  ;;  %v2097_v54 = vadd.f32 1.0, %v3111_v48 }
 0xeb9   :  { %2829 = vmatprep.mubr.msk.f32.mxu0 %vm358_vm3, %v2100_v49  ;;  %v2096_v56 = vadd.f32 1.0, %v3113_v53 }
 0xeba   :  { %2830 = vmatmul.mubr.msk.f32.gmra.mrb[30].mxu0 %vm358_vm3, %v2101_v50  ;;  %v2103_v14 = vmul.f32 %v2097_v54, %v2055_v59 }
 0xebb   :  { %v2102_v61 = vmul.f32 %v2096_v56, %v2054_v58 }
 0xebd   :  { %2832 = vmatprep.mubr.msk.f32.mxu0 %vm358_vm3, %v2102_v61 }
 0xebe   :  { %2833 = vmatmul.mubr.msk.f32.gmra.mrb[32].mxu0 %vm358_vm3, %v2103_v14 }
 0xf89   :  { %v2828_v63 = vpop.f32.mrb[28].mxu0 }
 0xf8a   :  { %v2203_v0 = vadd.f32 %v2828_v63, %v2356_v62  ;;  %v2197_v28 = vpop.f32.mrb[29].mxu0 }
 0xf8b   :  { %v2198_v43 = vadd.f32 %v2356_v62, %v2197_v28 }
 0xf8c   :  { %2227 = vst [vmem:[#allocation2 + $0x8] sm:$0xff] %v2203_v0 }
 0xf8d   :  { %2226 = vst [vmem:[#allocation2] sm:$0xff] %v2198_v43  ;;  %v2831_v29 = vpop.f32.mrb[30].mxu0 }
 0xf8e   :  { %v2213_v1 = vadd.f32 %v2831_v29, %v2356_v62  ;;  %v2207_v39 = vpop.f32.mrb[31].mxu0 }
 0xf8f   :  { %v2208_v3 = vadd.f32 %v2356_v62, %v2207_v39 }
 0xf90   :  { %2229 = vst [vmem:[#allocation2 + $0x18] sm:$0xff] %v2213_v1 }
 0xf91   :  { %2228 = vst [vmem:[#allocation2 + $0x10] sm:$0xff] %v2208_v3  ;;  %v2834_v5 = vpop.f32.mrb[32].mxu0 }
 0xf92   :  { %v2223_v6 = vadd.f32 %v2834_v5, %v2356_v62  ;;  %v2217_v7 = vpop.f32.mrb[33].mxu0 }
 0xf93   :  { %v2218_v2 = vadd.f32 %v2356_v62, %v2217_v7 }
 0xf94   :  { %2231 = vst [vmem:[#allocation2 + $0x28] sm:$0xff] %v2223_v6 }
 0xf95   :  { %2230 = vst [vmem:[#allocation2 + $0x20] sm:$0xff] %v2218_v2 }
 0xf96   :  { %3135 = shalt.err (!%p3132_p4)
}
 0xf97   :  { %s3136_s28 = scalar_lea.hbm %s3964_s14, 768 }
 0xf98   :  { %p3137_p5 = scmp.ne.s32.totalorder %s3964_s14, %s3136_s28  ;;  %p3140_p6 = scmp.lt.u32.totalorder %s3136_s28, %s3964_s14 }
 0xf9a   :  { %p3142_p7 = pnand %p3140_p6, %p3137_p5 }
 0xf9c   :  { %3145 = shalt.err (!%p3142_p7)
}
 0xf9d   :  { %s3157_s10 = smov 128   ;;  %s3158_s17 = smov 8  }
 0xf9e   :  { %2243 = dma.vmem_to_hbm [thread:$0]  %s2238_s5, 768, %s3964_s14, [#allocation3], %s3157_s10, %s3157_s10, %s3158_s17  }
 0xf9f   :  { %3146 = dma.done.wait [#allocation3], 768  }
 0xfa0   :  { %3147 = vsyncadd [#allocation3], 4294966528 }
 0xfa1   :  { %2247 = vsyncpa [#allocation3], 1 }

</bundles_post_ra>
